<compile_context>
chip_gen: v5e
topology: v5e:2x2
jax: 0.10.0
libtpu: 0.0.40
codegen_flags: <defaults>
</compile_context>

<pallas_src>
import functools

import jax
import jax.numpy as jnp
from jax.experimental import pallas as pl
from jax.experimental.pallas import tpu as pltpu

LANE = 128            # TPU lane width: conv channel dims are padded to this
LEAKY_SLOPE = 0.1
EPS_BN = 1e-5

_COMPILER_PARAMS = pltpu.CompilerParams(
    dimension_semantics=("arbitrary",),
    vmem_limit_bytes=32 * 1024 * 1024,
)


# ----------------------------------------------------------------------------
# small helpers (XLA-side layout glue)
# ----------------------------------------------------------------------------
def _ceil_to(x, m):
    return (x + m - 1) // m * m


def _pad_last(x, n):
    c = x.shape[-1]
    if c == n:
        return x
    cfg = [(0, 0)] * (x.ndim - 1) + [(0, n - c)]
    return jnp.pad(x, cfg)


def _spec(shape):
    zeros = (0,) * len(shape)
    return pl.BlockSpec(shape, lambda i: zeros)


def _bias_row(b, co_pad):
    return _pad_last(b.reshape(1, -1), co_pad).astype(jnp.float32)


def _im2col_3x3(x_nhwc, stride):
    """3x3 / pad 1 im2col (XLA-side layout glue) -> bf16 patches (M, 9*Cin)."""
    B, H, W, C = x_nhwc.shape
    Ho = (H - 1) // stride + 1
    Wo = (W - 1) // stride + 1
    xp = jnp.pad(x_nhwc, ((0, 0), (1, 1), (1, 1), (0, 0)))
    taps = [xp[:, ky:ky + stride * Ho:stride, kx:kx + stride * Wo:stride, :]
            for ky in range(3) for kx in range(3)]
    patches = jnp.stack(taps, axis=3).reshape(B * Ho * Wo, 9 * C)
    return patches.astype(jnp.bfloat16), Ho, Wo


def _conv_w_mat(w_oihw, co_pad):
    """(Cout, Cin, 3, 3) -> (9*Cin, co_pad) bf16 matching _im2col_3x3 order."""
    Cout, Cin, kH, kW = w_oihw.shape
    w = jnp.transpose(w_oihw, (2, 3, 1, 0)).reshape(kH * kW * Cin, Cout)
    return _pad_last(w, co_pad).astype(jnp.bfloat16)


def _conv_w_taps(w_oihw, ci_pad, co_pad):
    """(Cout, Cin, 3, 3) -> (9, ci_pad, co_pad) bf16, tap-major, zero padded."""
    Cout, Cin, kH, kW = w_oihw.shape
    w = jnp.transpose(w_oihw, (2, 3, 1, 0)).reshape(kH * kW, Cin, Cout)
    w = jnp.pad(w, ((0, 0), (0, ci_pad - Cin), (0, co_pad - Cout)))
    return w.astype(jnp.bfloat16)


def _shifted_inputs(x_nhwc):
    """Zero-pad H by 1 and build the three W-shifted copies (kx = 0, 1, 2).

    tap(ky, kx)[b, h, w, :] == shifted[kx][b, h + ky, w, :], so every 3x3 tap
    inside the head kernel is a leading-dim slice (no HBM im2col for the head,
    no unaligned sublane slicing in-kernel).
    """
    B, H, W, C = x_nhwc.shape
    xh = jnp.pad(x_nhwc, ((0, 0), (1, 1), (0, 0), (0, 0)))        # (B, H+2, W, C)
    z = jnp.zeros((B, H + 2, 1, C), x_nhwc.dtype)
    x_l = jnp.concatenate([z, xh[:, :, : W - 1, :]], axis=2)      # kx = 0 (dx = -1)
    x_r = jnp.concatenate([xh[:, :, 1:, :], z], axis=2)           # kx = 2 (dx = +1)
    return x_l, xh, x_r


# ----------------------------------------------------------------------------
# Pallas kernels
# ----------------------------------------------------------------------------
def _matmul_bias_leaky_kernel(p_ref, w_ref, b_ref, o_ref, *, slope):
    """(M, K)bf16 @ (K, N)bf16 + bias -> LeakyReLU; f32 MXU accumulation."""
    y = jnp.dot(p_ref[...], w_ref[...], preferred_element_type=jnp.float32)
    y = y + b_ref[...]
    o_ref[...] = jnp.where(y >= 0.0, y, slope * y)


def _regression_head_kernel(x0_ref, x1_ref, x2_ref, w1_ref, w2_ref, b2_ref,
                            o_ref, *, eps, slope):
    """self.regression fused in one call:
       3x3 conv (bias dropped) -> BatchNorm2d (train stats, affine = identity)
       -> LeakyReLU(0.1) -> 1x1 conv + bias.  Everything stays in VMEM.

    x{0,1,2}_ref: (B, H+2, W, CK) f32  H-padded, W-shifted copies (kx = 0,1,2)
    w1_ref:       (9, CK, N1)    bf16  per-tap 3x3 weights (K, N lane padded)
    w2_ref:       (N1, N2)       bf16  1x1 weights
    b2_ref:       (1, N2)        f32
    o_ref:        (B, H, W, N2)  f32   lane-dense output
    """
    B, HP, W, CK = x1_ref.shape
    H = HP - 2
    M = B * H * W
    N1 = w1_ref.shape[-1]
    xs = (x0_ref, x1_ref, x2_ref)
    acc = jnp.zeros((M, N1), jnp.float32)
    for ky in range(3):
        for kx in range(3):
            tap = xs[kx][:, ky:ky + H, :, :].reshape(M, CK).astype(jnp.bfloat16)
            acc = acc + jnp.dot(tap, w1_ref[ky * 3 + kx],
                                preferred_element_type=jnp.float32)
    # BatchNorm2d in (default) training mode with weight=1, bias=0: batch
    # statistics over all B*H*W rows per channel, biased variance.  The conv
    # bias is omitted on purpose: it is exactly cancelled by the mean
    # subtraction (and is zero-initialized in the reference module anyway).
    mean = jnp.mean(acc, axis=0, keepdims=True)
    var = jnp.mean(jnp.square(acc - mean), axis=0, keepdims=True)
    y = (acc - mean) * jax.lax.rsqrt(var + eps)
    y = jnp.where(y >= 0.0, y, slope * y)
    z = jnp.dot(y.astype(jnp.bfloat16), w2_ref[...],
                preferred_element_type=jnp.float32) + b2_ref[...]
    o_ref[...] = z.reshape(B, H, W, z.shape[-1])


# ----------------------------------------------------------------------------
# pallas_call wrappers
# ----------------------------------------------------------------------------
def conv3x3_leaky(x_nhwc, w_oihw, bias, *, stride=1, co_pad=LANE,
                  slope=LEAKY_SLOPE):
    """3x3 / pad 1 conv (stride 1 or 2) + bias + LeakyReLU as one fused matmul."""
    B = x_nhwc.shape[0]
    patches, Ho, Wo = _im2col_3x3(x_nhwc, stride)
    w = _conv_w_mat(w_oihw, co_pad)
    b = _bias_row(bias, co_pad)
    M = patches.shape[0]
    kernel = functools.partial(_matmul_bias_leaky_kernel, slope=slope)
    out = pl.pallas_call(
        kernel,
        out_shape=jax.ShapeDtypeStruct((M, co_pad), jnp.float32),
        grid=(1,),
        in_specs=[_spec(patches.shape), _spec(w.shape), _spec(b.shape)],
        out_specs=_spec((M, co_pad)),
        compiler_params=_COMPILER_PARAMS,
    )(patches, w, b)
    return out.reshape(B, Ho, Wo, co_pad)


def regression_head(x_nhwc, w1_oihw, w2_oihw, b2, *, slope=LEAKY_SLOPE,
                    eps=EPS_BN):
    """Conv3x3 -> BatchNorm2d -> LeakyReLU(0.1) -> Conv1x1, one pallas_call."""
    B, H, W, Cin = x_nhwc.shape
    Ch = w1_oihw.shape[0]                 # hidden channels
    Cout = w2_oihw.shape[0]               # len(anchors) * (5 + num_classes)
    ci_pad = _ceil_to(Cin, LANE)
    ch_pad = _ceil_to(Ch, LANE)
    co_pad = _ceil_to(Cout, LANE)
    x = _pad_last(x_nhwc, ci_pad)
    x0, x1, x2 = _shifted_inputs(x)
    w1 = _conv_w_taps(w1_oihw, ci_pad, ch_pad)                       # (9,128,128)
    w2 = jnp.transpose(w2_oihw.reshape(Cout, Ch), (1, 0))            # (Ch, Cout)
    w2 = jnp.pad(w2, ((0, ch_pad - Ch), (0, co_pad - Cout))).astype(jnp.bfloat16)
    b2r = _bias_row(b2, co_pad)
    kernel = functools.partial(_regression_head_kernel, eps=eps, slope=slope)
    out = pl.pallas_call(
        kernel,
        out_shape=jax.ShapeDtypeStruct((B, H, W, co_pad), jnp.float32),
        grid=(1,),
        in_specs=[_spec(x0.shape), _spec(x1.shape), _spec(x2.shape),
                  _spec(w1.shape), _spec(w2.shape), _spec(b2r.shape)],
        out_specs=_spec((B, H, W, co_pad)),
        compiler_params=_COMPILER_PARAMS,
    )(x0, x1, x2, w1, w2, b2r)
    return out[..., :Cout]                                           # NHWC


# ----------------------------------------------------------------------------
# parameter init (kaiming_normal fan_in, leaky_relu gain; bias = 0)
# ----------------------------------------------------------------------------
def kaiming_conv(key, cout, cin, kh, kw):
    fan_in = cin * kh * kw
    std = (2.0 ** 0.5) / (fan_in ** 0.5)
    w = std * jax.random.normal(key, (cout, cin, kh, kw), dtype=jnp.float32)
    b = jnp.zeros((cout,), dtype=jnp.float32)
    return w, b


def init_params(key, c_in, c_back, c_res, num_classes, num_anchors):
    ks = jax.random.split(key, 4)
    p = {}
    p["backbone_w"], p["backbone_b"] = kaiming_conv(ks[0], c_back, c_in, 3, 3)
    p["resconv_w"], p["resconv_b"] = kaiming_conv(ks[1], c_res, c_back, 3, 3)
    c_cat = 4 * c_back + c_res
    c_hidden = 32                                   # scaled-down 1024
    c_out = num_anchors * (5 + num_classes)         # 5 * 25 = 125
    p["reg1_w"], p["reg1_b"] = kaiming_conv(ks[2], c_hidden, c_cat, 3, 3)
    p["reg2_w"], p["reg2_b"] = kaiming_conv(ks[3], c_out, c_hidden, 1, 1)
    return p


# ----------------------------------------------------------------------------
# YoLo_v2.forward
# ----------------------------------------------------------------------------
def yolo_v2_forward(params, i_nchw):
    B = i_nchw.shape[0]
    x = jnp.transpose(i_nchw, (0, 2, 3, 1))                          # NHWC
    # r = self.backbone(i)     (stand-in: 3x3 s1 p1 conv + LeakyReLU)
    C = params["backbone_w"].shape[0]
    r = conv3x3_leaky(x, params["backbone_w"], params["backbone_b"],
                      stride=1)[..., :C]
    H, W = r.shape[1], r.shape[2]
    # o = self.resconv(r)      (stand-in: 3x3 s2 p1 conv + LeakyReLU)
    Cr = params["resconv_w"].shape[0]
    o = conv3x3_leaky(r, params["resconv_w"], params["resconv_b"],
                      stride=2)[..., :Cr]
    # r = r.view(-1, C*4, H//2, W//2).contiguous()  -- raw reinterpret of the
    # contiguous NCHW buffer (matches torch .view), then channel concat with o.
    r_nchw = jnp.transpose(r, (0, 3, 1, 2)).reshape(B, C * 4, H // 2, W // 2)
    o_nchw = jnp.transpose(o, (0, 3, 1, 2))
    cat_nhwc = jnp.transpose(jnp.concatenate([r_nchw, o_nchw], axis=1),
                             (0, 2, 3, 1))
    # self.regression (fused): Conv3x3 -> BatchNorm2d -> LeakyReLU -> Conv1x1.
    # params["reg1_b"] is intentionally unused (cancelled by BN mean-sub).
    y = regression_head(cat_nhwc, params["reg1_w"], params["reg2_w"],
                        params["reg2_b"])
    return jnp.transpose(y, (0, 3, 1, 2))                            # NCHW


if __name__ == "__main__":
    key = jax.random.PRNGKey(0)
    k_param, k_x = jax.random.split(key)

    B, C_IN, H, W = 2, 4, 16, 16          # small NCHW input
    C_BACK, C_RES = 16, 32                # stand-in backbone / resconv channels
    NUM_CLASSES, NUM_ANCHORS = 20, 5      # module defaults -> 125 output channels

    params = init_params(k_param, C_IN, C_BACK, C_RES, NUM_CLASSES, NUM_ANCHORS)
    x = jax.random.normal(k_x, (B, C_IN, H, W), dtype=jnp.float32)

    fwd = jax.jit(yolo_v2_forward)
    out = jax.block_until_ready(fwd(params, x))

    expected = (B, NUM_ANCHORS * (5 + NUM_CLASSES), H // 2, W // 2)
    assert out.shape == expected, (out.shape, expected)
    assert bool(jnp.all(jnp.isfinite(out)))
    print("KERNEL_OK")
</pallas_src>

<mosaic_0001>
module attributes {stable_mosaic.version = 11 : i64} {
  func.func @_matmul_bias_leaky_kernel(%arg0: i32, %arg1: memref<512x36xbf16, #tpu.memory_space<vmem>>, %arg2: memref<36x128xbf16, #tpu.memory_space<vmem>>, %arg3: memref<1x128xf32, #tpu.memory_space<vmem>>, %arg4: memref<512x128xf32, #tpu.memory_space<vmem>>) attributes {dimension_semantics = [#tpu.dimension_semantics<arbitrary>], iteration_bounds = array<i64: 1>, scalar_prefetch = 0 : i64, scratch_operands = 0 : i64, tpu.core_type = #tpu.core_type<tc>, window_params = [{pipeline_mode = #tpu.pipeline_mode<synchronous>, transform_indices = @transform_0, window_bounds = array<i64: 512, 36>}, {pipeline_mode = #tpu.pipeline_mode<synchronous>, transform_indices = @transform_1, window_bounds = array<i64: 36, 128>}, {pipeline_mode = #tpu.pipeline_mode<synchronous>, transform_indices = @transform_2, window_bounds = array<i64: 1, 128>}, {pipeline_mode = #tpu.pipeline_mode<synchronous>, transform_indices = @transform_3, window_bounds = array<i64: 512, 128>}]} {
    %c0 = arith.constant 0 : index
    %c0_0 = arith.constant 0 : index
    %0 = vector.load %arg1[%c0, %c0_0] : memref<512x36xbf16, #tpu.memory_space<vmem>>, vector<512x36xbf16>
    %c0_1 = arith.constant 0 : index
    %c0_2 = arith.constant 0 : index
    %1 = vector.load %arg2[%c0_1, %c0_2] : memref<36x128xbf16, #tpu.memory_space<vmem>>, vector<36x128xbf16>
    %cst = arith.constant dense<0.000000e+00> : vector<512x128xf32>
    %2 = tpu.matmul %0, %1, %cst {dimension_numbers = #tpu.dot_dimension_numbers<[1], [0], [0], [1], [0, 0, 1, 1], [], []>} : vector<512x36xbf16>, vector<36x128xbf16>, vector<512x128xf32> -> vector<512x128xf32>
    %c0_3 = arith.constant 0 : index
    %c0_4 = arith.constant 0 : index
    %3 = vector.load %arg3[%c0_3, %c0_4] : memref<1x128xf32, #tpu.memory_space<vmem>>, vector<1x128xf32>
    %4 = vector.broadcast %3 : vector<1x128xf32> to vector<512x128xf32>
    %5 = arith.addf %2, %4 : vector<512x128xf32>
    %cst_5 = arith.constant 0.000000e+00 : f32
    %6 = vector.broadcast %cst_5 : f32 to vector<512x128xf32>
    %7 = arith.cmpf oge, %5, %6 : vector<512x128xf32>
    %cst_6 = arith.constant 1.000000e-01 : f32
    %8 = vector.broadcast %cst_6 : f32 to vector<512x128xf32>
    %9 = arith.mulf %8, %5 : vector<512x128xf32>
    %10 = arith.select %7, %5, %9 : vector<512x128xi1>, vector<512x128xf32>
    %c0_7 = arith.constant 0 : index
    %c0_8 = arith.constant 0 : index
    %11 = vector.load %arg4[%c0_7, %c0_8] : memref<512x128xf32, #tpu.memory_space<vmem>>, vector<512x128xf32>
    tpu.vector_store %arg4[%c0_7, %c0_8], %10 {strides = array<i32>} : memref<512x128xf32, #tpu.memory_space<vmem>>, vector<512x128xf32>,
    return
  }
  func.func @transform_0(%arg0: i32) -> (i32, i32) {
    %c0_i32 = arith.constant 0 : i32
    %c0_i32_0 = arith.constant 0 : i32
    %c0_i32_1 = arith.constant 0 : i32
    return %c0_i32, %c0_i32_0 : i32, i32
  }
  func.func @transform_1(%arg0: i32) -> (i32, i32) {
    %c0_i32 = arith.constant 0 : i32
    %c0_i32_0 = arith.constant 0 : i32
    %c0_i32_1 = arith.constant 0 : i32
    return %c0_i32, %c0_i32_0 : i32, i32
  }
  func.func @transform_2(%arg0: i32) -> (i32, i32) {
    %c0_i32 = arith.constant 0 : i32
    %c0_i32_0 = arith.constant 0 : i32
    %c0_i32_1 = arith.constant 0 : i32
    return %c0_i32, %c0_i32_0 : i32, i32
  }
  func.func @transform_3(%arg0: i32) -> (i32, i32) {
    %c0_i32 = arith.constant 0 : i32
    %c0_i32_0 = arith.constant 0 : i32
    %c0_i32_1 = arith.constant 0 : i32
    return %c0_i32, %c0_i32_0 : i32, i32
  }
}

module attributes {stable_mosaic.version = 11 : i64} {
  func.func @_matmul_bias_leaky_kernel(%arg0: i32, %arg1: memref<128x144xbf16, #tpu.memory_space<vmem>>, %arg2: memref<144x128xbf16, #tpu.memory_space<vmem>>, %arg3: memref<1x128xf32, #tpu.memory_space<vmem>>, %arg4: memref<128x128xf32, #tpu.memory_space<vmem>>) attributes {dimension_semantics = [#tpu.dimension_semantics<arbitrary>], iteration_bounds = array<i64: 1>, scalar_prefetch = 0 : i64, scratch_operands = 0 : i64, tpu.core_type = #tpu.core_type<tc>, window_params = [{pipeline_mode = #tpu.pipeline_mode<synchronous>, transform_indices = @transform_0, window_bounds = array<i64: 128, 144>}, {pipeline_mode = #tpu.pipeline_mode<synchronous>, transform_indices = @transform_1, window_bounds = array<i64: 144, 128>}, {pipeline_mode = #tpu.pipeline_mode<synchronous>, transform_indices = @transform_2, window_bounds = array<i64: 1, 128>}, {pipeline_mode = #tpu.pipeline_mode<synchronous>, transform_indices = @transform_3, window_bounds = array<i64: 128, 128>}]} {
    %c0 = arith.constant 0 : index
    %c0_0 = arith.constant 0 : index
    %0 = vector.load %arg1[%c0, %c0_0] : memref<128x144xbf16, #tpu.memory_space<vmem>>, vector<128x144xbf16>
    %c0_1 = arith.constant 0 : index
    %c0_2 = arith.constant 0 : index
    %1 = vector.load %arg2[%c0_1, %c0_2] : memref<144x128xbf16, #tpu.memory_space<vmem>>, vector<144x128xbf16>
    %cst = arith.constant dense<0.000000e+00> : vector<128x128xf32>
    %2 = tpu.matmul %0, %1, %cst {dimension_numbers = #tpu.dot_dimension_numbers<[1], [0], [0], [1], [0, 0, 1, 1], [], []>} : vector<128x144xbf16>, vector<144x128xbf16>, vector<128x128xf32> -> vector<128x128xf32>
    %c0_3 = arith.constant 0 : index
    %c0_4 = arith.constant 0 : index
    %3 = vector.load %arg3[%c0_3, %c0_4] : memref<1x128xf32, #tpu.memory_space<vmem>>, vector<1x128xf32>
    %4 = vector.broadcast %3 : vector<1x128xf32> to vector<128x128xf32>
    %5 = arith.addf %2, %4 : vector<128x128xf32>
    %cst_5 = arith.constant 0.000000e+00 : f32
    %6 = vector.broadcast %cst_5 : f32 to vector<128x128xf32>
    %7 = arith.cmpf oge, %5, %6 : vector<128x128xf32>
    %cst_6 = arith.constant 1.000000e-01 : f32
    %8 = vector.broadcast %cst_6 : f32 to vector<128x128xf32>
    %9 = arith.mulf %8, %5 : vector<128x128xf32>
    %10 = arith.select %7, %5, %9 : vector<128x128xi1>, vector<128x128xf32>
    %c0_7 = arith.constant 0 : index
    %c0_8 = arith.constant 0 : index
    %11 = vector.load %arg4[%c0_7, %c0_8] : memref<128x128xf32, #tpu.memory_space<vmem>>, vector<128x128xf32>
    tpu.vector_store %arg4[%c0_7, %c0_8], %10 {strides = array<i32>} : memref<128x128xf32, #tpu.memory_space<vmem>>, vector<128x128xf32>,
    return
  }
  func.func @transform_0(%arg0: i32) -> (i32, i32) {
    %c0_i32 = arith.constant 0 : i32
    %c0_i32_0 = arith.constant 0 : i32
    %c0_i32_1 = arith.constant 0 : i32
    return %c0_i32, %c0_i32_0 : i32, i32
  }
  func.func @transform_1(%arg0: i32) -> (i32, i32) {
    %c0_i32 = arith.constant 0 : i32
    %c0_i32_0 = arith.constant 0 : i32
    %c0_i32_1 = arith.constant 0 : i32
    return %c0_i32, %c0_i32_0 : i32, i32
  }
  func.func @transform_2(%arg0: i32) -> (i32, i32) {
    %c0_i32 = arith.constant 0 : i32
    %c0_i32_0 = arith.constant 0 : i32
    %c0_i32_1 = arith.constant 0 : i32
    return %c0_i32, %c0_i32_0 : i32, i32
  }
  func.func @transform_3(%arg0: i32) -> (i32, i32) {
    %c0_i32 = arith.constant 0 : i32
    %c0_i32_0 = arith.constant 0 : i32
    %c0_i32_1 = arith.constant 0 : i32
    return %c0_i32, %c0_i32_0 : i32, i32
  }
}

module attributes {stable_mosaic.version = 11 : i64} {
  func.func @_regression_head_kernel(%arg0: i32, %arg1: memref<2x10x8x128xf32, #tpu.memory_space<vmem>>, %arg2: memref<2x10x8x128xf32, #tpu.memory_space<vmem>>, %arg3: memref<2x10x8x128xf32, #tpu.memory_space<vmem>>, %arg4: memref<9x128x128xbf16, #tpu.memory_space<vmem>>, %arg5: memref<128x128xbf16, #tpu.memory_space<vmem>>, %arg6: memref<1x128xf32, #tpu.memory_space<vmem>>, %arg7: memref<2x8x8x128xf32, #tpu.memory_space<vmem>>) attributes {dimension_semantics = [#tpu.dimension_semantics<arbitrary>], iteration_bounds = array<i64: 1>, scalar_prefetch = 0 : i64, scratch_operands = 0 : i64, tpu.core_type = #tpu.core_type<tc>, window_params = [{pipeline_mode = #tpu.pipeline_mode<synchronous>, transform_indices = @transform_0, window_bounds = array<i64: 2, 10, 8, 128>}, {pipeline_mode = #tpu.pipeline_mode<synchronous>, transform_indices = @transform_1, window_bounds = array<i64: 2, 10, 8, 128>}, {pipeline_mode = #tpu.pipeline_mode<synchronous>, transform_indices = @transform_2, window_bounds = array<i64: 2, 10, 8, 128>}, {pipeline_mode = #tpu.pipeline_mode<synchronous>, transform_indices = @transform_3, window_bounds = array<i64: 9, 128, 128>}, {pipeline_mode = #tpu.pipeline_mode<synchronous>, transform_indices = @transform_4, window_bounds = array<i64: 128, 128>}, {pipeline_mode = #tpu.pipeline_mode<synchronous>, transform_indices = @transform_5, window_bounds = array<i64: 1, 128>}, {pipeline_mode = #tpu.pipeline_mode<synchronous>, transform_indices = @transform_6, window_bounds = array<i64: 2, 8, 8, 128>}]} {
    %cst = arith.constant 0.000000e+00 : f32
    %0 = vector.broadcast %cst : f32 to vector<128x128xf32>
    %c0 = arith.constant 0 : index
    %c0_0 = arith.constant 0 : index
    %c0_1 = arith.constant 0 : index
    %c0_2 = arith.constant 0 : index
    %1 = vector.load %arg1[%c0, %c0_0, %c0_1, %c0_2] : memref<2x10x8x128xf32, #tpu.memory_space<vmem>>, vector<2x8x8x128xf32>
    %2 = vector.shape_cast %1 : vector<2x8x8x128xf32> to vector<128x128xf32>
    %3 = arith.truncf %2 : vector<128x128xf32> to vector<128x128xbf16>
    %c0_3 = arith.constant 0 : index
    %c0_4 = arith.constant 0 : index
    %c0_5 = arith.constant 0 : index
    %4 = vector.load %arg4[%c0_3, %c0_4, %c0_5] : memref<9x128x128xbf16, #tpu.memory_space<vmem>>, vector<1x128x128xbf16>
    %5 = vector.shape_cast %4 : vector<1x128x128xbf16> to vector<128x128xbf16>
    %cst_6 = arith.constant dense<0.000000e+00> : vector<128x128xf32>
    %6 = tpu.matmul %3, %5, %cst_6 {dimension_numbers = #tpu.dot_dimension_numbers<[1], [0], [0], [1], [0, 0, 1, 1], [], []>} : vector<128x128xbf16>, vector<128x128xbf16>, vector<128x128xf32> -> vector<128x128xf32>
    %7 = arith.addf %0, %6 : vector<128x128xf32>
    %c0_7 = arith.constant 0 : index
    %c0_8 = arith.constant 0 : index
    %c0_9 = arith.constant 0 : index
    %c0_10 = arith.constant 0 : index
    %8 = vector.load %arg2[%c0_7, %c0_8, %c0_9, %c0_10] : memref<2x10x8x128xf32, #tpu.memory_space<vmem>>, vector<2x8x8x128xf32>
    %9 = vector.shape_cast %8 : vector<2x8x8x128xf32> to vector<128x128xf32>
    %10 = arith.truncf %9 : vector<128x128xf32> to vector<128x128xbf16>
    %c1 = arith.constant 1 : index
    %c0_11 = arith.constant 0 : index
    %c0_12 = arith.constant 0 : index
    %11 = vector.load %arg4[%c1, %c0_11, %c0_12] : memref<9x128x128xbf16, #tpu.memory_space<vmem>>, vector<1x128x128xbf16>
    %12 = vector.shape_cast %11 : vector<1x128x128xbf16> to vector<128x128xbf16>
    %cst_13 = arith.constant dense<0.000000e+00> : vector<128x128xf32>
    %13 = tpu.matmul %10, %12, %cst_13 {dimension_numbers = #tpu.dot_dimension_numbers<[1], [0], [0], [1], [0, 0, 1, 1], [], []>} : vector<128x128xbf16>, vector<128x128xbf16>, vector<128x128xf32> -> vector<128x128xf32>
    %14 = arith.addf %7, %13 : vector<128x128xf32>
    %c0_14 = arith.constant 0 : index
    %c0_15 = arith.constant 0 : index
    %c0_16 = arith.constant 0 : index
    %c0_17 = arith.constant 0 : index
    %15 = vector.load %arg3[%c0_14, %c0_15, %c0_16, %c0_17] : memref<2x10x8x128xf32, #tpu.memory_space<vmem>>, vector<2x8x8x128xf32>
    %16 = vector.shape_cast %15 : vector<2x8x8x128xf32> to vector<128x128xf32>
    %17 = arith.truncf %16 : vector<128x128xf32> to vector<128x128xbf16>
    %c2 = arith.constant 2 : index
    %c0_18 = arith.constant 0 : index
    %c0_19 = arith.constant 0 : index
    %18 = vector.load %arg4[%c2, %c0_18, %c0_19] : memref<9x128x128xbf16, #tpu.memory_space<vmem>>, vector<1x128x128xbf16>
    %19 = vector.shape_cast %18 : vector<1x128x128xbf16> to vector<128x128xbf16>
    %cst_20 = arith.constant dense<0.000000e+00> : vector<128x128xf32>
    %20 = tpu.matmul %17, %19, %cst_20 {dimension_numbers = #tpu.dot_dimension_numbers<[1], [0], [0], [1], [0, 0, 1, 1], [], []>} : vector<128x128xbf16>, vector<128x128xbf16>, vector<128x128xf32> -> vector<128x128xf32>
    %21 = arith.addf %14, %20 : vector<128x128xf32>
    %c0_21 = arith.constant 0 : index
    %c1_22 = arith.constant 1 : index
    %c0_23 = arith.constant 0 : index
    %c0_24 = arith.constant 0 : index
    %22 = vector.load %arg1[%c0_21, %c1_22, %c0_23, %c0_24] : memref<2x10x8x128xf32, #tpu.memory_space<vmem>>, vector<2x8x8x128xf32>
    %23 = vector.shape_cast %22 : vector<2x8x8x128xf32> to vector<128x128xf32>
    %24 = arith.truncf %23 : vector<128x128xf32> to vector<128x128xbf16>
    %c3 = arith.constant 3 : index
    %c0_25 = arith.constant 0 : index
    %c0_26 = arith.constant 0 : index
    %25 = vector.load %arg4[%c3, %c0_25, %c0_26] : memref<9x128x128xbf16, #tpu.memory_space<vmem>>, vector<1x128x128xbf16>
    %26 = vector.shape_cast %25 : vector<1x128x128xbf16> to vector<128x128xbf16>
    %cst_27 = arith.constant dense<0.000000e+00> : vector<128x128xf32>
    %27 = tpu.matmul %24, %26, %cst_27 {dimension_numbers = #tpu.dot_dimension_numbers<[1], [0], [0], [1], [0, 0, 1, 1], [], []>} : vector<128x128xbf16>, vector<128x128xbf16>, vector<128x128xf32> -> vector<128x128xf32>
    %28 = arith.addf %21, %27 : vector<128x128xf32>
    %c0_28 = arith.constant 0 : index
    %c1_29 = arith.constant 1 : index
    %c0_30 = arith.constant 0 : index
    %c0_31 = arith.constant 0 : index
    %29 = vector.load %arg2[%c0_28, %c1_29, %c0_30, %c0_31] : memref<2x10x8x128xf32, #tpu.memory_space<vmem>>, vector<2x8x8x128xf32>
    %30 = vector.shape_cast %29 : vector<2x8x8x128xf32> to vector<128x128xf32>
    %31 = arith.truncf %30 : vector<128x128xf32> to vector<128x128xbf16>
    %c4 = arith.constant 4 : index
    %c0_32 = arith.constant 0 : index
    %c0_33 = arith.constant 0 : index
    %32 = vector.load %arg4[%c4, %c0_32, %c0_33] : memref<9x128x128xbf16, #tpu.memory_space<vmem>>, vector<1x128x128xbf16>
    %33 = vector.shape_cast %32 : vector<1x128x128xbf16> to vector<128x128xbf16>
    %cst_34 = arith.constant dense<0.000000e+00> : vector<128x128xf32>
    %34 = tpu.matmul %31, %33, %cst_34 {dimension_numbers = #tpu.dot_dimension_numbers<[1], [0], [0], [1], [0, 0, 1, 1], [], []>} : vector<128x128xbf16>, vector<128x128xbf16>, vector<128x128xf32> -> vector<128x128xf32>
    %35 = arith.addf %28, %34 : vector<128x128xf32>
    %c0_35 = arith.constant 0 : index
    %c1_36 = arith.constant 1 : index
    %c0_37 = arith.constant 0 : index
    %c0_38 = arith.constant 0 : index
    %36 = vector.load %arg3[%c0_35, %c1_36, %c0_37, %c0_38] : memref<2x10x8x128xf32, #tpu.memory_space<vmem>>, vector<2x8x8x128xf32>
    %37 = vector.shape_cast %36 : vector<2x8x8x128xf32> to vector<128x128xf32>
    %38 = arith.truncf %37 : vector<128x128xf32> to vector<128x128xbf16>
    %c5 = arith.constant 5 : index
    %c0_39 = arith.constant 0 : index
    %c0_40 = arith.constant 0 : index
    %39 = vector.load %arg4[%c5, %c0_39, %c0_40] : memref<9x128x128xbf16, #tpu.memory_space<vmem>>, vector<1x128x128xbf16>
    %40 = vector.shape_cast %39 : vector<1x128x128xbf16> to vector<128x128xbf16>
    %cst_41 = arith.constant dense<0.000000e+00> : vector<128x128xf32>
    %41 = tpu.matmul %38, %40, %cst_41 {dimension_numbers = #tpu.dot_dimension_numbers<[1], [0], [0], [1], [0, 0, 1, 1], [], []>} : vector<128x128xbf16>, vector<128x128xbf16>, vector<128x128xf32> -> vector<128x128xf32>
    %42 = arith.addf %35, %41 : vector<128x128xf32>
    %c0_42 = arith.constant 0 : index
    %c2_43 = arith.constant 2 : index
    %c0_44 = arith.constant 0 : index
    %c0_45 = arith.constant 0 : index
    %43 = vector.load %arg1[%c0_42, %c2_43, %c0_44, %c0_45] : memref<2x10x8x128xf32, #tpu.memory_space<vmem>>, vector<2x8x8x128xf32>
    %44 = vector.shape_cast %43 : vector<2x8x8x128xf32> to vector<128x128xf32>
    %45 = arith.truncf %44 : vector<128x128xf32> to vector<128x128xbf16>
    %c6 = arith.constant 6 : index
    %c0_46 = arith.constant 0 : index
    %c0_47 = arith.constant 0 : index
    %46 = vector.load %arg4[%c6, %c0_46, %c0_47] : memref<9x128x128xbf16, #tpu.memory_space<vmem>>, vector<1x128x128xbf16>
    %47 = vector.shape_cast %46 : vector<1x128x128xbf16> to vector<128x128xbf16>
    %cst_48 = arith.constant dense<0.000000e+00> : vector<128x128xf32>
    %48 = tpu.matmul %45, %47, %cst_48 {dimension_numbers = #tpu.dot_dimension_numbers<[1], [0], [0], [1], [0, 0, 1, 1], [], []>} : vector<128x128xbf16>, vector<128x128xbf16>, vector<128x128xf32> -> vector<128x128xf32>
    %49 = arith.addf %42, %48 : vector<128x128xf32>
    %c0_49 = arith.constant 0 : index
    %c2_50 = arith.constant 2 : index
    %c0_51 = arith.constant 0 : index
    %c0_52 = arith.constant 0 : index
    %50 = vector.load %arg2[%c0_49, %c2_50, %c0_51, %c0_52] : memref<2x10x8x128xf32, #tpu.memory_space<vmem>>, vector<2x8x8x128xf32>
    %51 = vector.shape_cast %50 : vector<2x8x8x128xf32> to vector<128x128xf32>
    %52 = arith.truncf %51 : vector<128x128xf32> to vector<128x128xbf16>
    %c7 = arith.constant 7 : index
    %c0_53 = arith.constant 0 : index
    %c0_54 = arith.constant 0 : index
    %53 = vector.load %arg4[%c7, %c0_53, %c0_54] : memref<9x128x128xbf16, #tpu.memory_space<vmem>>, vector<1x128x128xbf16>
    %54 = vector.shape_cast %53 : vector<1x128x128xbf16> to vector<128x128xbf16>
    %cst_55 = arith.constant dense<0.000000e+00> : vector<128x128xf32>
    %55 = tpu.matmul %52, %54, %cst_55 {dimension_numbers = #tpu.dot_dimension_numbers<[1], [0], [0], [1], [0, 0, 1, 1], [], []>} : vector<128x128xbf16>, vector<128x128xbf16>, vector<128x128xf32> -> vector<128x128xf32>
    %56 = arith.addf %49, %55 : vector<128x128xf32>
    %c0_56 = arith.constant 0 : index
    %c2_57 = arith.constant 2 : index
    %c0_58 = arith.constant 0 : index
    %c0_59 = arith.constant 0 : index
    %57 = vector.load %arg3[%c0_56, %c2_57, %c0_58, %c0_59] : memref<2x10x8x128xf32, #tpu.memory_space<vmem>>, vector<2x8x8x128xf32>
    %58 = vector.shape_cast %57 : vector<2x8x8x128xf32> to vector<128x128xf32>
    %59 = arith.truncf %58 : vector<128x128xf32> to vector<128x128xbf16>
    %c8 = arith.constant 8 : index
    %c0_60 = arith.constant 0 : index
    %c0_61 = arith.constant 0 : index
    %60 = vector.load %arg4[%c8, %c0_60, %c0_61] : memref<9x128x128xbf16, #tpu.memory_space<vmem>>, vector<1x128x128xbf16>
    %61 = vector.shape_cast %60 : vector<1x128x128xbf16> to vector<128x128xbf16>
    %cst_62 = arith.constant dense<0.000000e+00> : vector<128x128xf32>
    %62 = tpu.matmul %59, %61, %cst_62 {dimension_numbers = #tpu.dot_dimension_numbers<[1], [0], [0], [1], [0, 0, 1, 1], [], []>} : vector<128x128xbf16>, vector<128x128xbf16>, vector<128x128xf32> -> vector<128x128xf32>
    %63 = arith.addf %56, %62 : vector<128x128xf32>
    %cst_63 = arith.constant dense<0.000000e+00> : vector<128xf32>
    %64 = vector.multi_reduction <add>, %63, %cst_63 [0] : vector<128x128xf32> to vector<128xf32>
    %65 = vector.shape_cast %64 : vector<128xf32> to vector<1x128xf32>
    %cst_64 = arith.constant 1.280000e+02 : f32
    %66 = vector.broadcast %cst_64 : f32 to vector<1x128xf32>
    %67 = arith.divf %65, %66 : vector<1x128xf32>
    %68 = vector.broadcast %67 : vector<1x128xf32> to vector<128x128xf32>
    %69 = arith.subf %63, %68 : vector<128x128xf32>
    %70 = arith.mulf %69, %69 : vector<128x128xf32>
    %cst_65 = arith.constant dense<0.000000e+00> : vector<128xf32>
    %71 = vector.multi_reduction <add>, %70, %cst_65 [0] : vector<128x128xf32> to vector<128xf32>
    %72 = vector.shape_cast %71 : vector<128xf32> to vector<1x128xf32>
    %cst_66 = arith.constant 1.280000e+02 : f32
    %73 = vector.broadcast %cst_66 : f32 to vector<1x128xf32>
    %74 = arith.divf %72, %73 : vector<1x128xf32>
    %75 = vector.broadcast %67 : vector<1x128xf32> to vector<128x128xf32>
    %76 = arith.subf %63, %75 : vector<128x128xf32>
    %cst_67 = arith.constant 9.99999974E-6 : f32
    %77 = vector.broadcast %cst_67 : f32 to vector<1x128xf32>
    %78 = arith.addf %74, %77 : vector<1x128xf32>
    %79 = math.rsqrt %78 : vector<1x128xf32>
    %80 = vector.broadcast %79 : vector<1x128xf32> to vector<128x128xf32>
    %81 = arith.mulf %76, %80 : vector<128x128xf32>
    %cst_68 = arith.constant 0.000000e+00 : f32
    %82 = vector.broadcast %cst_68 : f32 to vector<128x128xf32>
    %83 = arith.cmpf oge, %81, %82 : vector<128x128xf32>
    %cst_69 = arith.constant 1.000000e-01 : f32
    %84 = vector.broadcast %cst_69 : f32 to vector<128x128xf32>
    %85 = arith.mulf %84, %81 : vector<128x128xf32>
    %86 = arith.select %83, %81, %85 : vector<128x128xi1>, vector<128x128xf32>
    %87 = arith.truncf %86 : vector<128x128xf32> to vector<128x128xbf16>
    %c0_70 = arith.constant 0 : index
    %c0_71 = arith.constant 0 : index
    %88 = vector.load %arg5[%c0_70, %c0_71] : memref<128x128xbf16, #tpu.memory_space<vmem>>, vector<128x128xbf16>
    %cst_72 = arith.constant dense<0.000000e+00> : vector<128x128xf32>
    %89 = tpu.matmul %87, %88, %cst_72 {dimension_numbers = #tpu.dot_dimension_numbers<[1], [0], [0], [1], [0, 0, 1, 1], [], []>} : vector<128x128xbf16>, vector<128x128xbf16>, vector<128x128xf32> -> vector<128x128xf32>
    %c0_73 = arith.constant 0 : index
    %c0_74 = arith.constant 0 : index
    %90 = vector.load %arg6[%c0_73, %c0_74] : memref<1x128xf32, #tpu.memory_space<vmem>>, vector<1x128xf32>
    %91 = vector.broadcast %90 : vector<1x128xf32> to vector<128x128xf32>
    %92 = arith.addf %89, %91 : vector<128x128xf32>
    %93 = vector.shape_cast %92 : vector<128x128xf32> to vector<2x8x8x128xf32>
    %c0_75 = arith.constant 0 : index
    %c0_76 = arith.constant 0 : index
    %c0_77 = arith.constant 0 : index
    %c0_78 = arith.constant 0 : index
    %94 = vector.load %arg7[%c0_75, %c0_76, %c0_77, %c0_78] : memref<2x8x8x128xf32, #tpu.memory_space<vmem>>, vector<2x8x8x128xf32>
    tpu.vector_store %arg7[%c0_75, %c0_76, %c0_77, %c0_78], %93 {strides = array<i32>} : memref<2x8x8x128xf32, #tpu.memory_space<vmem>>, vector<2x8x8x128xf32>,
    return
  }
  func.func @transform_0(%arg0: i32) -> (i32, i32, i32, i32) {
    %c0_i32 = arith.constant 0 : i32
    %c0_i32_0 = arith.constant 0 : i32
    %c0_i32_1 = arith.constant 0 : i32
    %c0_i32_2 = arith.constant 0 : i32
    %c0_i32_3 = arith.constant 0 : i32
    return %c0_i32, %c0_i32_0, %c0_i32_1, %c0_i32_2 : i32, i32, i32, i32
  }
  func.func @transform_1(%arg0: i32) -> (i32, i32, i32, i32) {
    %c0_i32 = arith.constant 0 : i32
    %c0_i32_0 = arith.constant 0 : i32
    %c0_i32_1 = arith.constant 0 : i32
    %c0_i32_2 = arith.constant 0 : i32
    %c0_i32_3 = arith.constant 0 : i32
    return %c0_i32, %c0_i32_0, %c0_i32_1, %c0_i32_2 : i32, i32, i32, i32
  }
  func.func @transform_2(%arg0: i32) -> (i32, i32, i32, i32) {
    %c0_i32 = arith.constant 0 : i32
    %c0_i32_0 = arith.constant 0 : i32
    %c0_i32_1 = arith.constant 0 : i32
    %c0_i32_2 = arith.constant 0 : i32
    %c0_i32_3 = arith.constant 0 : i32
    return %c0_i32, %c0_i32_0, %c0_i32_1, %c0_i32_2 : i32, i32, i32, i32
  }
  func.func @transform_3(%arg0: i32) -> (i32, i32, i32) {
    %c0_i32 = arith.constant 0 : i32
    %c0_i32_0 = arith.constant 0 : i32
    %c0_i32_1 = arith.constant 0 : i32
    %c0_i32_2 = arith.constant 0 : i32
    return %c0_i32, %c0_i32_0, %c0_i32_1 : i32, i32, i32
  }
  func.func @transform_4(%arg0: i32) -> (i32, i32) {
    %c0_i32 = arith.constant 0 : i32
    %c0_i32_0 = arith.constant 0 : i32
    %c0_i32_1 = arith.constant 0 : i32
    return %c0_i32, %c0_i32_0 : i32, i32
  }
  func.func @transform_5(%arg0: i32) -> (i32, i32) {
    %c0_i32 = arith.constant 0 : i32
    %c0_i32_0 = arith.constant 0 : i32
    %c0_i32_1 = arith.constant 0 : i32
    return %c0_i32, %c0_i32_0 : i32, i32
  }
  func.func @transform_6(%arg0: i32) -> (i32, i32, i32, i32) {
    %c0_i32 = arith.constant 0 : i32
    %c0_i32_0 = arith.constant 0 : i32
    %c0_i32_1 = arith.constant 0 : i32
    %c0_i32_2 = arith.constant 0 : i32
    %c0_i32_3 = arith.constant 0 : i32
    return %c0_i32, %c0_i32_0, %c0_i32_1, %c0_i32_2 : i32, i32, i32, i32
  }
}

</mosaic_0001>

<bundles_post_ra>
// kernel: yolo_v2_forward.3
= control target key start
LH: loop header
LB: loop body
LE: loop exit
PB: predicated region body
PF: predicated region fallthrough
CT: control target
= control target key end

     0   :  { %vm360_vm0 = vcmask 1041408   ;;  %vm263_vm1 = vcmask 293888   ;;  %s1423_s1 = inlined_call_operand.vmem [shape: bf16[36,128], index: 1, kind: input, shape index: {}]   ;;  %s1424_s2 = inlined_call_operand.vmem [shape: f32[1,128], index: 2, kind: input, shape index: {}]   ;;  %s1425_s0 = inlined_call_operand.vmem [shape: bf16[512,36], index: 0, kind: input, shape index: {}]   ;;  %s1426_s3 = inlined_call_operand.vmem [shape: f32[512,128], index: 3, kind: output, shape index: {}]  }
   0x1   :  { %v83_v0 = vld [vmem:[%s1423_s1 + $0x10] sm:$0x3]  ;;  %v994_v4 = vld [vmem:[%s1423_s1 + $0x8] sm:$0xff]  ;;  %v993_v5 = vld [vmem:[%s1423_s1] sm:$0xff] }
   0x2   :  { %v257_v1 = vunpack.c.l.b16 %v83_v0  ;;  %v961_v6 = vld [vmem:[%s1425_s0] sm:$0xff]  ;;  %v962_v10 = vld [vmem:[%s1425_s0 + $0x8] sm:$0xff]  ;;  %v963_v14 = vld [vmem:[%s1425_s0 + $0x10] sm:$0xff] }
   0x3   :  { %v969_v7 = vld [vmem:[%s1425_s0 + $0x40] sm:$0xff]  ;;  %v970_v11 = vld [vmem:[%s1425_s0 + $0x48] sm:$0xff]  ;;  %v971_v15 = vld [vmem:[%s1425_s0 + $0x50] sm:$0xff] }
   0x4   :  { %v260_v2 = vpack.c.b16 %v257_v1, %v257_v1  ;;  %v977_v8 = vld [vmem:[%s1425_s0 + $0x80] sm:$0xff]  ;;  %v978_v12 = vld [vmem:[%s1425_s0 + $0x88] sm:$0xff]  ;;  %v979_v16 = vld [vmem:[%s1425_s0 + $0x90] sm:$0xff] }
   0x5   :  { %v985_v9 = vld [vmem:[%s1425_s0 + $0xc0] sm:$0xff]  ;;  %v986_v13 = vld [vmem:[%s1425_s0 + $0xc8] sm:$0xff]  ;;  %v987_v17 = vld [vmem:[%s1425_s0 + $0xd0] sm:$0xff] }
   0x6   :  { %v362_v3 = vsel %vm360_vm0, %v260_v2, 0  ;;  %v964_v18 = vld [vmem:[%s1425_s0 + $0x18] sm:$0xff]  ;;  %v965_v22 = vld [vmem:[%s1425_s0 + $0x20] sm:$0xff]  ;;  %v966_v26 = vld [vmem:[%s1425_s0 + $0x28] sm:$0xff] }
   0x7   :  { %369 = vmatpush.bf16.msra.mxu0 %v362_v3  ;;  %995 = vmatpush.bf16.msra.mxu1 %v362_v3  ;;  %v972_v19 = vld [vmem:[%s1425_s0 + $0x58] sm:$0xff]  ;;  %v973_v23 = vld [vmem:[%s1425_s0 + $0x60] sm:$0xff]  ;;  %v974_v27 = vld [vmem:[%s1425_s0 + $0x68] sm:$0xff] }
   0x8   :  { %996 = vmatpush.bf16.msra.mxu2 %v362_v3  ;;  %997 = vmatpush.bf16.msra.mxu3 %v362_v3  ;;  %v980_v20 = vld [vmem:[%s1425_s0 + $0x98] sm:$0xff]  ;;  %v981_v24 = vld [vmem:[%s1425_s0 + $0xa0] sm:$0xff]  ;;  %v982_v28 = vld [vmem:[%s1425_s0 + $0xa8] sm:$0xff] }
   0x9   :  { %v988_v21 = vld [vmem:[%s1425_s0 + $0xd8] sm:$0xff]  ;;  %v989_v25 = vld [vmem:[%s1425_s0 + $0xe0] sm:$0xff]  ;;  %v990_v29 = vld [vmem:[%s1425_s0 + $0xe8] sm:$0xff] }
   0xa   :  { %v967_v30 = vld [vmem:[%s1425_s0 + $0x30] sm:$0xff]  ;;  %v968_v34 = vld [vmem:[%s1425_s0 + $0x38] sm:$0xff]  ;;  %v1165_v38 = vld [vmem:[%s1424_s2] ss:$0 sm:$0xff] }
   0xb   :  { %370 = vmatpush.bf16.msra.mxu0 %v994_v4  ;;  %998 = vmatpush.bf16.msra.mxu1 %v994_v4  ;;  %v975_v31 = vld [vmem:[%s1425_s0 + $0x70] sm:$0xff]  ;;  %v976_v35 = vld [vmem:[%s1425_s0 + $0x78] sm:$0xff] }
   0xc   :  { %999 = vmatpush.bf16.msra.mxu2 %v994_v4  ;;  %1000 = vmatpush.bf16.msra.mxu3 %v994_v4  ;;  %v983_v32 = vld [vmem:[%s1425_s0 + $0xb0] sm:$0xff]  ;;  %v984_v36 = vld [vmem:[%s1425_s0 + $0xb8] sm:$0xff] }
   0xd   :  { %v991_v33 = vld [vmem:[%s1425_s0 + $0xf0] sm:$0xff]  ;;  %v992_v37 = vld [vmem:[%s1425_s0 + $0xf8] sm:$0xff] }
   0xf   :  { %371 = vmatpush.bf16.msra.mxu0 %v993_v5  ;;  %1001 = vmatpush.bf16.msra.mxu1 %v993_v5 }
  0x10   :  { %1002 = vmatpush.bf16.msra.mxu2 %v993_v5  ;;  %1003 = vmatpush.bf16.msra.mxu3 %v993_v5 }
  0x12   :  { %929 = vmatmul.msk.bf16.vlgmr.msra.gmra.mxu0 %vm263_vm1, %v961_v6  ;;  %937 = vmatmul.msk.bf16.vlgmr.msra.gmra.mxu1 %vm263_vm1, %v969_v7 }
  0x13   :  { %945 = vmatmul.msk.bf16.vlgmr.msra.gmra.mxu2 %vm263_vm1, %v977_v8  ;;  %953 = vmatmul.msk.bf16.vlgmr.msra.gmra.mxu3 %vm263_vm1, %v985_v9 }
  0x22   :  { %930 = vmatmul.msk.bf16.gmra.mxu0 %vm263_vm1, %v962_v10  ;;  %938 = vmatmul.msk.bf16.gmra.mxu1 %vm263_vm1, %v970_v11 }
  0x23   :  { %946 = vmatmul.msk.bf16.gmra.mxu2 %vm263_vm1, %v978_v12  ;;  %954 = vmatmul.msk.bf16.gmra.mxu3 %vm263_vm1, %v986_v13 }
  0x32   :  { %931 = vmatmul.msk.bf16.gmra.mxu0 %vm263_vm1, %v963_v14  ;;  %939 = vmatmul.msk.bf16.gmra.mxu1 %vm263_vm1, %v971_v15 }
  0x33   :  { %947 = vmatmul.msk.bf16.gmra.mxu2 %vm263_vm1, %v979_v16  ;;  %955 = vmatmul.msk.bf16.gmra.mxu3 %vm263_vm1, %v987_v17 }
  0x42   :  { %932 = vmatmul.msk.bf16.gmra.mxu0 %vm263_vm1, %v964_v18  ;;  %940 = vmatmul.msk.bf16.gmra.mxu1 %vm263_vm1, %v972_v19 }
  0x43   :  { %948 = vmatmul.msk.bf16.gmra.mxu2 %vm263_vm1, %v980_v20  ;;  %956 = vmatmul.msk.bf16.gmra.mxu3 %vm263_vm1, %v988_v21 }
  0x52   :  { %933 = vmatmul.msk.bf16.gmra.mxu0 %vm263_vm1, %v965_v22  ;;  %941 = vmatmul.msk.bf16.gmra.mxu1 %vm263_vm1, %v973_v23 }
  0x53   :  { %949 = vmatmul.msk.bf16.gmra.mxu2 %vm263_vm1, %v981_v24  ;;  %957 = vmatmul.msk.bf16.gmra.mxu3 %vm263_vm1, %v989_v25 }
  0x62   :  { %934 = vmatmul.msk.bf16.gmra.mxu0 %vm263_vm1, %v966_v26  ;;  %942 = vmatmul.msk.bf16.gmra.mxu1 %vm263_vm1, %v974_v27 }
  0x63   :  { %950 = vmatmul.msk.bf16.gmra.mxu2 %vm263_vm1, %v982_v28  ;;  %958 = vmatmul.msk.bf16.gmra.mxu3 %vm263_vm1, %v990_v29 }
  0x72   :  { %935 = vmatmul.msk.bf16.gmra.mxu0 %vm263_vm1, %v967_v30  ;;  %943 = vmatmul.msk.bf16.gmra.mxu1 %vm263_vm1, %v975_v31 }
  0x73   :  { %951 = vmatmul.msk.bf16.gmra.mxu2 %vm263_vm1, %v983_v32  ;;  %959 = vmatmul.msk.bf16.gmra.mxu3 %vm263_vm1, %v991_v33 }
  0x82   :  { %936 = vmatmul.msk.bf16.gmra.mxu0 %vm263_vm1, %v968_v34  ;;  %944 = vmatmul.msk.bf16.gmra.mxu1 %vm263_vm1, %v976_v35 }
  0x83   :  { %952 = vmatmul.msk.bf16.gmra.mxu2 %vm263_vm1, %v984_v36  ;;  %960 = vmatmul.msk.bf16.gmra.mxu3 %vm263_vm1, %v992_v37 }
  0x8f   :  { %v373_v39 = vpop.f32.mrf.mxu0  ;;  %v413_v40 = vpop.f32.mrf.mxu1 }
  0x90   :  { %v374_v41 = vadd.f32 %v1165_v38, %v373_v39  ;;  %v414_v42 = vadd.f32 %v1165_v38, %v413_v40 }
  0x92   :  { %vm533_vm2 = vcmp.ge.f32.partialorder %v374_v41, 0.0  ;;  %v597_v43 = vmul.f32 0.1, %v374_v41  ;;  %vm549_vm3 = vcmp.ge.f32.partialorder %v414_v42, 0.0  ;;  %v613_v44 = vmul.f32 0.1, %v414_v42 }
  0x94   :  { %v661_v45 = vsel %vm533_vm2, %v374_v41, %v597_v43  ;;  %v677_v46 = vsel %vm549_vm3, %v414_v42, %v613_v44 }
  0x95   :  { %725 = vst [vmem:[%s1426_s3] sm:$0xff] %v661_v45 }
  0x96   :  { %741 = vst [vmem:[%s1426_s3 + $0x80] sm:$0xff] %v677_v46  ;;  %v453_v47 = vpop.f32.mrf.mxu2  ;;  %v493_v48 = vpop.f32.mrf.mxu3 }
  0x97   :  { %v454_v49 = vadd.f32 %v1165_v38, %v453_v47  ;;  %v494_v50 = vadd.f32 %v1165_v38, %v493_v48  ;;  %v375_v51 = vpop.f32.mrf.mxu0  ;;  %v415_v52 = vpop.f32.mrf.mxu1 }
  0x98   :  { %v376_v53 = vadd.f32 %v1165_v38, %v375_v51  ;;  %v416_v54 = vadd.f32 %v1165_v38, %v415_v52 }
  0x99   :  { %vm565_vm4 = vcmp.ge.f32.partialorder %v454_v49, 0.0  ;;  %v629_v55 = vmul.f32 0.1, %v454_v49  ;;  %vm581_vm5 = vcmp.ge.f32.partialorder %v494_v50, 0.0  ;;  %v645_v56 = vmul.f32 0.1, %v494_v50 }
  0x9a   :  { %vm534_vm6 = vcmp.ge.f32.partialorder %v376_v53, 0.0  ;;  %v598_v57 = vmul.f32 0.1, %v376_v53  ;;  %vm550_vm7 = vcmp.ge.f32.partialorder %v416_v54, 0.0  ;;  %v614_v58 = vmul.f32 0.1, %v416_v54 }
  0x9b   :  { %v693_v59 = vsel %vm565_vm4, %v454_v49, %v629_v55  ;;  %v709_v60 = vsel %vm581_vm5, %v494_v50, %v645_v56 }
  0x9c   :  { %757 = vst [vmem:[%s1426_s3 + $0x100] sm:$0xff] %v693_v59  ;;  %v662_v61 = vsel %vm534_vm6, %v376_v53, %v598_v57  ;;  %v678_v62 = vsel %vm550_vm7, %v416_v54, %v614_v58 }
  0x9d   :  { %773 = vst [vmem:[%s1426_s3 + $0x180] sm:$0xff] %v709_v60 }
  0x9e   :  { %726 = vst [vmem:[%s1426_s3 + $0x8] sm:$0xff] %v662_v61  ;;  %v455_v63 = vpop.f32.mrf.mxu2  ;;  %v495_v0 = vpop.f32.mrf.mxu3 }
  0x9f   :  { %742 = vst [vmem:[%s1426_s3 + $0x88] sm:$0xff] %v678_v62  ;;  %v456_v1 = vadd.f32 %v1165_v38, %v455_v63  ;;  %v496_v2 = vadd.f32 %v1165_v38, %v495_v0  ;;  %v378_v3 = vpop.f32.mrf.mxu0  ;;  %v418_v4 = vpop.f32.mrf.mxu1 }
  0xa0   :  { %v379_v5 = vadd.f32 %v1165_v38, %v378_v3  ;;  %v419_v6 = vadd.f32 %v1165_v38, %v418_v4 }
  0xa1   :  { %vm566_vm8 = vcmp.ge.f32.partialorder %v456_v1, 0.0  ;;  %v630_v7 = vmul.f32 0.1, %v456_v1  ;;  %vm582_vm9 = vcmp.ge.f32.partialorder %v496_v2, 0.0  ;;  %v646_v8 = vmul.f32 0.1, %v496_v2 }
  0xa2   :  { %vm535_vm10 = vcmp.ge.f32.partialorder %v379_v5, 0.0  ;;  %v599_v9 = vmul.f32 0.1, %v379_v5  ;;  %vm551_vm11 = vcmp.ge.f32.partialorder %v419_v6, 0.0  ;;  %v615_v10 = vmul.f32 0.1, %v419_v6 }
  0xa3   :  { %v694_v11 = vsel %vm566_vm8, %v456_v1, %v630_v7  ;;  %v710_v12 = vsel %vm582_vm9, %v496_v2, %v646_v8 }
  0xa4   :  { %758 = vst [vmem:[%s1426_s3 + $0x108] sm:$0xff] %v694_v11  ;;  %v663_v13 = vsel %vm535_vm10, %v379_v5, %v599_v9  ;;  %v679_v14 = vsel %vm551_vm11, %v419_v6, %v615_v10 }
  0xa5   :  { %774 = vst [vmem:[%s1426_s3 + $0x188] sm:$0xff] %v710_v12 }
  0xa6   :  { %727 = vst [vmem:[%s1426_s3 + $0x10] sm:$0xff] %v663_v13  ;;  %v458_v15 = vpop.f32.mrf.mxu2  ;;  %v498_v16 = vpop.f32.mrf.mxu3 }
  0xa7   :  { %743 = vst [vmem:[%s1426_s3 + $0x90] sm:$0xff] %v679_v14  ;;  %v459_v17 = vadd.f32 %v1165_v38, %v458_v15  ;;  %v499_v18 = vadd.f32 %v1165_v38, %v498_v16  ;;  %v380_v19 = vpop.f32.mrf.mxu0  ;;  %v420_v20 = vpop.f32.mrf.mxu1 }
  0xa8   :  { %v381_v21 = vadd.f32 %v1165_v38, %v380_v19  ;;  %v421_v22 = vadd.f32 %v1165_v38, %v420_v20 }
  0xa9   :  { %vm567_vm12 = vcmp.ge.f32.partialorder %v459_v17, 0.0  ;;  %v631_v23 = vmul.f32 0.1, %v459_v17  ;;  %vm583_vm13 = vcmp.ge.f32.partialorder %v499_v18, 0.0  ;;  %v647_v24 = vmul.f32 0.1, %v499_v18 }
  0xaa   :  { %vm536_vm14 = vcmp.ge.f32.partialorder %v381_v21, 0.0  ;;  %v600_v25 = vmul.f32 0.1, %v381_v21  ;;  %vm552_vm15 = vcmp.ge.f32.partialorder %v421_v22, 0.0  ;;  %v616_v26 = vmul.f32 0.1, %v421_v22 }
  0xab   :  { %v695_v27 = vsel %vm567_vm12, %v459_v17, %v631_v23  ;;  %v711_v28 = vsel %vm583_vm13, %v499_v18, %v647_v24 }
  0xac   :  { %759 = vst [vmem:[%s1426_s3 + $0x110] sm:$0xff] %v695_v27  ;;  %v664_v29 = vsel %vm536_vm14, %v381_v21, %v600_v25  ;;  %v680_v30 = vsel %vm552_vm15, %v421_v22, %v616_v26 }
  0xad   :  { %775 = vst [vmem:[%s1426_s3 + $0x190] sm:$0xff] %v711_v28 }
  0xae   :  { %728 = vst [vmem:[%s1426_s3 + $0x18] sm:$0xff] %v664_v29  ;;  %v460_v31 = vpop.f32.mrf.mxu2  ;;  %v500_v32 = vpop.f32.mrf.mxu3 }
  0xaf   :  { %744 = vst [vmem:[%s1426_s3 + $0x98] sm:$0xff] %v680_v30  ;;  %v461_v33 = vadd.f32 %v1165_v38, %v460_v31  ;;  %v501_v34 = vadd.f32 %v1165_v38, %v500_v32  ;;  %v383_v35 = vpop.f32.mrf.mxu0  ;;  %v423_v36 = vpop.f32.mrf.mxu1 }
  0xb0   :  { %v384_v37 = vadd.f32 %v1165_v38, %v383_v35  ;;  %v424_v39 = vadd.f32 %v1165_v38, %v423_v36 }
  0xb1   :  { %vm568_vm0 = vcmp.ge.f32.partialorder %v461_v33, 0.0  ;;  %v632_v40 = vmul.f32 0.1, %v461_v33  ;;  %vm584_vm1 = vcmp.ge.f32.partialorder %v501_v34, 0.0  ;;  %v648_v41 = vmul.f32 0.1, %v501_v34 }
  0xb2   :  { %vm537_vm2 = vcmp.ge.f32.partialorder %v384_v37, 0.0  ;;  %v601_v42 = vmul.f32 0.1, %v384_v37  ;;  %vm553_vm3 = vcmp.ge.f32.partialorder %v424_v39, 0.0  ;;  %v617_v43 = vmul.f32 0.1, %v424_v39 }
  0xb3   :  { %v696_v44 = vsel %vm568_vm0, %v461_v33, %v632_v40  ;;  %v712_v45 = vsel %vm584_vm1, %v501_v34, %v648_v41 }
  0xb4   :  { %760 = vst [vmem:[%s1426_s3 + $0x118] sm:$0xff] %v696_v44  ;;  %v665_v46 = vsel %vm537_vm2, %v384_v37, %v601_v42  ;;  %v681_v47 = vsel %vm553_vm3, %v424_v39, %v617_v43 }
  0xb5   :  { %776 = vst [vmem:[%s1426_s3 + $0x198] sm:$0xff] %v712_v45 }
  0xb6   :  { %729 = vst [vmem:[%s1426_s3 + $0x20] sm:$0xff] %v665_v46  ;;  %v463_v48 = vpop.f32.mrf.mxu2  ;;  %v503_v49 = vpop.f32.mrf.mxu3 }
  0xb7   :  { %745 = vst [vmem:[%s1426_s3 + $0xa0] sm:$0xff] %v681_v47  ;;  %v464_v50 = vadd.f32 %v1165_v38, %v463_v48  ;;  %v504_v51 = vadd.f32 %v1165_v38, %v503_v49  ;;  %v385_v52 = vpop.f32.mrf.mxu0  ;;  %v425_v53 = vpop.f32.mrf.mxu1 }
  0xb8   :  { %v386_v54 = vadd.f32 %v1165_v38, %v385_v52  ;;  %v426_v55 = vadd.f32 %v1165_v38, %v425_v53 }
  0xb9   :  { %vm569_vm4 = vcmp.ge.f32.partialorder %v464_v50, 0.0  ;;  %v633_v56 = vmul.f32 0.1, %v464_v50  ;;  %vm585_vm5 = vcmp.ge.f32.partialorder %v504_v51, 0.0  ;;  %v649_v57 = vmul.f32 0.1, %v504_v51 }
  0xba   :  { %vm538_vm6 = vcmp.ge.f32.partialorder %v386_v54, 0.0  ;;  %v602_v58 = vmul.f32 0.1, %v386_v54  ;;  %vm554_vm7 = vcmp.ge.f32.partialorder %v426_v55, 0.0  ;;  %v618_v59 = vmul.f32 0.1, %v426_v55 }
  0xbb   :  { %v697_v60 = vsel %vm569_vm4, %v464_v50, %v633_v56  ;;  %v713_v61 = vsel %vm585_vm5, %v504_v51, %v649_v57 }
  0xbc   :  { %761 = vst [vmem:[%s1426_s3 + $0x120] sm:$0xff] %v697_v60  ;;  %v666_v62 = vsel %vm538_vm6, %v386_v54, %v602_v58  ;;  %v682_v63 = vsel %vm554_vm7, %v426_v55, %v618_v59 }
  0xbd   :  { %777 = vst [vmem:[%s1426_s3 + $0x1a0] sm:$0xff] %v713_v61 }
  0xbe   :  { %730 = vst [vmem:[%s1426_s3 + $0x28] sm:$0xff] %v666_v62  ;;  %v465_v0 = vpop.f32.mrf.mxu2  ;;  %v505_v1 = vpop.f32.mrf.mxu3 }
  0xbf   :  { %746 = vst [vmem:[%s1426_s3 + $0xa8] sm:$0xff] %v682_v63  ;;  %v466_v2 = vadd.f32 %v1165_v38, %v465_v0  ;;  %v506_v3 = vadd.f32 %v1165_v38, %v505_v1  ;;  %v388_v4 = vpop.f32.mrf.mxu0  ;;  %v428_v5 = vpop.f32.mrf.mxu1 }
  0xc0   :  { %v389_v6 = vadd.f32 %v1165_v38, %v388_v4  ;;  %v429_v7 = vadd.f32 %v1165_v38, %v428_v5 }
  0xc1   :  { %vm570_vm8 = vcmp.ge.f32.partialorder %v466_v2, 0.0  ;;  %v634_v8 = vmul.f32 0.1, %v466_v2  ;;  %vm586_vm9 = vcmp.ge.f32.partialorder %v506_v3, 0.0  ;;  %v650_v9 = vmul.f32 0.1, %v506_v3 }
  0xc2   :  { %vm539_vm10 = vcmp.ge.f32.partialorder %v389_v6, 0.0  ;;  %v603_v10 = vmul.f32 0.1, %v389_v6  ;;  %vm555_vm11 = vcmp.ge.f32.partialorder %v429_v7, 0.0  ;;  %v619_v11 = vmul.f32 0.1, %v429_v7 }
  0xc3   :  { %v698_v12 = vsel %vm570_vm8, %v466_v2, %v634_v8  ;;  %v714_v13 = vsel %vm586_vm9, %v506_v3, %v650_v9 }
  0xc4   :  { %762 = vst [vmem:[%s1426_s3 + $0x128] sm:$0xff] %v698_v12  ;;  %v667_v14 = vsel %vm539_vm10, %v389_v6, %v603_v10  ;;  %v683_v15 = vsel %vm555_vm11, %v429_v7, %v619_v11 }
  0xc5   :  { %778 = vst [vmem:[%s1426_s3 + $0x1a8] sm:$0xff] %v714_v13 }
  0xc6   :  { %731 = vst [vmem:[%s1426_s3 + $0x30] sm:$0xff] %v667_v14  ;;  %v468_v16 = vpop.f32.mrf.mxu2  ;;  %v508_v17 = vpop.f32.mrf.mxu3 }
  0xc7   :  { %747 = vst [vmem:[%s1426_s3 + $0xb0] sm:$0xff] %v683_v15  ;;  %v469_v18 = vadd.f32 %v1165_v38, %v468_v16  ;;  %v509_v19 = vadd.f32 %v1165_v38, %v508_v17  ;;  %v390_v20 = vpop.f32.mrf.mxu0  ;;  %v430_v21 = vpop.f32.mrf.mxu1 }
  0xc8   :  { %v391_v22 = vadd.f32 %v1165_v38, %v390_v20  ;;  %v431_v23 = vadd.f32 %v1165_v38, %v430_v21 }
  0xc9   :  { %vm571_vm12 = vcmp.ge.f32.partialorder %v469_v18, 0.0  ;;  %v635_v24 = vmul.f32 0.1, %v469_v18  ;;  %vm587_vm13 = vcmp.ge.f32.partialorder %v509_v19, 0.0  ;;  %v651_v25 = vmul.f32 0.1, %v509_v19 }
  0xca   :  { %vm540_vm14 = vcmp.ge.f32.partialorder %v391_v22, 0.0  ;;  %v604_v26 = vmul.f32 0.1, %v391_v22  ;;  %vm556_vm15 = vcmp.ge.f32.partialorder %v431_v23, 0.0  ;;  %v620_v27 = vmul.f32 0.1, %v431_v23 }
  0xcb   :  { %v699_v28 = vsel %vm571_vm12, %v469_v18, %v635_v24  ;;  %v715_v29 = vsel %vm587_vm13, %v509_v19, %v651_v25 }
  0xcc   :  { %763 = vst [vmem:[%s1426_s3 + $0x130] sm:$0xff] %v699_v28  ;;  %v668_v30 = vsel %vm540_vm14, %v391_v22, %v604_v26  ;;  %v684_v31 = vsel %vm556_vm15, %v431_v23, %v620_v27 }
  0xcd   :  { %779 = vst [vmem:[%s1426_s3 + $0x1b0] sm:$0xff] %v715_v29 }
  0xce   :  { %732 = vst [vmem:[%s1426_s3 + $0x38] sm:$0xff] %v668_v30  ;;  %v470_v32 = vpop.f32.mrf.mxu2  ;;  %v510_v33 = vpop.f32.mrf.mxu3 }
  0xcf   :  { %748 = vst [vmem:[%s1426_s3 + $0xb8] sm:$0xff] %v684_v31  ;;  %v471_v34 = vadd.f32 %v1165_v38, %v470_v32  ;;  %v511_v35 = vadd.f32 %v1165_v38, %v510_v33  ;;  %v393_v36 = vpop.f32.mrf.mxu0  ;;  %v433_v37 = vpop.f32.mrf.mxu1 }
  0xd0   :  { %v394_v39 = vadd.f32 %v1165_v38, %v393_v36  ;;  %v434_v40 = vadd.f32 %v1165_v38, %v433_v37 }
  0xd1   :  { %vm572_vm0 = vcmp.ge.f32.partialorder %v471_v34, 0.0  ;;  %v636_v41 = vmul.f32 0.1, %v471_v34  ;;  %vm588_vm1 = vcmp.ge.f32.partialorder %v511_v35, 0.0  ;;  %v652_v42 = vmul.f32 0.1, %v511_v35 }
  0xd2   :  { %vm541_vm2 = vcmp.ge.f32.partialorder %v394_v39, 0.0  ;;  %v605_v43 = vmul.f32 0.1, %v394_v39  ;;  %vm557_vm3 = vcmp.ge.f32.partialorder %v434_v40, 0.0  ;;  %v621_v44 = vmul.f32 0.1, %v434_v40 }
  0xd3   :  { %v700_v45 = vsel %vm572_vm0, %v471_v34, %v636_v41  ;;  %v716_v46 = vsel %vm588_vm1, %v511_v35, %v652_v42 }
  0xd4   :  { %764 = vst [vmem:[%s1426_s3 + $0x138] sm:$0xff] %v700_v45  ;;  %v669_v47 = vsel %vm541_vm2, %v394_v39, %v605_v43  ;;  %v685_v48 = vsel %vm557_vm3, %v434_v40, %v621_v44 }
  0xd5   :  { %780 = vst [vmem:[%s1426_s3 + $0x1b8] sm:$0xff] %v716_v46 }
  0xd6   :  { %733 = vst [vmem:[%s1426_s3 + $0x40] sm:$0xff] %v669_v47  ;;  %v473_v49 = vpop.f32.mrf.mxu2  ;;  %v513_v50 = vpop.f32.mrf.mxu3 }
  0xd7   :  { %749 = vst [vmem:[%s1426_s3 + $0xc0] sm:$0xff] %v685_v48  ;;  %v474_v51 = vadd.f32 %v1165_v38, %v473_v49  ;;  %v514_v52 = vadd.f32 %v1165_v38, %v513_v50  ;;  %v395_v53 = vpop.f32.mrf.mxu0  ;;  %v435_v54 = vpop.f32.mrf.mxu1 }
  0xd8   :  { %v396_v55 = vadd.f32 %v1165_v38, %v395_v53  ;;  %v436_v56 = vadd.f32 %v1165_v38, %v435_v54 }
  0xd9   :  { %vm573_vm4 = vcmp.ge.f32.partialorder %v474_v51, 0.0  ;;  %v637_v57 = vmul.f32 0.1, %v474_v51  ;;  %vm589_vm5 = vcmp.ge.f32.partialorder %v514_v52, 0.0  ;;  %v653_v58 = vmul.f32 0.1, %v514_v52 }
  0xda   :  { %vm542_vm6 = vcmp.ge.f32.partialorder %v396_v55, 0.0  ;;  %v606_v59 = vmul.f32 0.1, %v396_v55  ;;  %vm558_vm7 = vcmp.ge.f32.partialorder %v436_v56, 0.0  ;;  %v622_v60 = vmul.f32 0.1, %v436_v56 }
  0xdb   :  { %v701_v61 = vsel %vm573_vm4, %v474_v51, %v637_v57  ;;  %v717_v62 = vsel %vm589_vm5, %v514_v52, %v653_v58 }
  0xdc   :  { %765 = vst [vmem:[%s1426_s3 + $0x140] sm:$0xff] %v701_v61  ;;  %v670_v63 = vsel %vm542_vm6, %v396_v55, %v606_v59  ;;  %v686_v0 = vsel %vm558_vm7, %v436_v56, %v622_v60 }
  0xdd   :  { %781 = vst [vmem:[%s1426_s3 + $0x1c0] sm:$0xff] %v717_v62 }
  0xde   :  { %734 = vst [vmem:[%s1426_s3 + $0x48] sm:$0xff] %v670_v63  ;;  %v475_v1 = vpop.f32.mrf.mxu2  ;;  %v515_v2 = vpop.f32.mrf.mxu3 }
  0xdf   :  { %750 = vst [vmem:[%s1426_s3 + $0xc8] sm:$0xff] %v686_v0  ;;  %v476_v3 = vadd.f32 %v1165_v38, %v475_v1  ;;  %v516_v4 = vadd.f32 %v1165_v38, %v515_v2  ;;  %v398_v5 = vpop.f32.mrf.mxu0  ;;  %v438_v6 = vpop.f32.mrf.mxu1 }
  0xe0   :  { %v399_v7 = vadd.f32 %v1165_v38, %v398_v5  ;;  %v439_v8 = vadd.f32 %v1165_v38, %v438_v6 }
  0xe1   :  { %vm574_vm8 = vcmp.ge.f32.partialorder %v476_v3, 0.0  ;;  %v638_v9 = vmul.f32 0.1, %v476_v3  ;;  %vm590_vm9 = vcmp.ge.f32.partialorder %v516_v4, 0.0  ;;  %v654_v10 = vmul.f32 0.1, %v516_v4 }
  0xe2   :  { %vm543_vm10 = vcmp.ge.f32.partialorder %v399_v7, 0.0  ;;  %v607_v11 = vmul.f32 0.1, %v399_v7  ;;  %vm559_vm11 = vcmp.ge.f32.partialorder %v439_v8, 0.0  ;;  %v623_v12 = vmul.f32 0.1, %v439_v8 }
  0xe3   :  { %v702_v13 = vsel %vm574_vm8, %v476_v3, %v638_v9  ;;  %v718_v14 = vsel %vm590_vm9, %v516_v4, %v654_v10 }
  0xe4   :  { %766 = vst [vmem:[%s1426_s3 + $0x148] sm:$0xff] %v702_v13  ;;  %v671_v15 = vsel %vm543_vm10, %v399_v7, %v607_v11  ;;  %v687_v16 = vsel %vm559_vm11, %v439_v8, %v623_v12 }
  0xe5   :  { %782 = vst [vmem:[%s1426_s3 + $0x1c8] sm:$0xff] %v718_v14 }
  0xe6   :  { %735 = vst [vmem:[%s1426_s3 + $0x50] sm:$0xff] %v671_v15  ;;  %v478_v17 = vpop.f32.mrf.mxu2  ;;  %v518_v18 = vpop.f32.mrf.mxu3 }
  0xe7   :  { %751 = vst [vmem:[%s1426_s3 + $0xd0] sm:$0xff] %v687_v16  ;;  %v479_v19 = vadd.f32 %v1165_v38, %v478_v17  ;;  %v519_v20 = vadd.f32 %v1165_v38, %v518_v18  ;;  %v400_v21 = vpop.f32.mrf.mxu0  ;;  %v440_v22 = vpop.f32.mrf.mxu1 }
  0xe8   :  { %v401_v23 = vadd.f32 %v1165_v38, %v400_v21  ;;  %v441_v24 = vadd.f32 %v1165_v38, %v440_v22 }
  0xe9   :  { %vm575_vm12 = vcmp.ge.f32.partialorder %v479_v19, 0.0  ;;  %v639_v25 = vmul.f32 0.1, %v479_v19  ;;  %vm591_vm13 = vcmp.ge.f32.partialorder %v519_v20, 0.0  ;;  %v655_v26 = vmul.f32 0.1, %v519_v20 }
  0xea   :  { %vm544_vm14 = vcmp.ge.f32.partialorder %v401_v23, 0.0  ;;  %v608_v27 = vmul.f32 0.1, %v401_v23  ;;  %vm560_vm15 = vcmp.ge.f32.partialorder %v441_v24, 0.0  ;;  %v624_v28 = vmul.f32 0.1, %v441_v24 }
  0xeb   :  { %v703_v29 = vsel %vm575_vm12, %v479_v19, %v639_v25  ;;  %v719_v30 = vsel %vm591_vm13, %v519_v20, %v655_v26 }
  0xec   :  { %767 = vst [vmem:[%s1426_s3 + $0x150] sm:$0xff] %v703_v29  ;;  %v672_v31 = vsel %vm544_vm14, %v401_v23, %v608_v27  ;;  %v688_v32 = vsel %vm560_vm15, %v441_v24, %v624_v28 }
  0xed   :  { %783 = vst [vmem:[%s1426_s3 + $0x1d0] sm:$0xff] %v719_v30 }
  0xee   :  { %736 = vst [vmem:[%s1426_s3 + $0x58] sm:$0xff] %v672_v31  ;;  %v480_v33 = vpop.f32.mrf.mxu2  ;;  %v520_v34 = vpop.f32.mrf.mxu3 }
  0xef   :  { %752 = vst [vmem:[%s1426_s3 + $0xd8] sm:$0xff] %v688_v32  ;;  %v481_v35 = vadd.f32 %v1165_v38, %v480_v33  ;;  %v521_v36 = vadd.f32 %v1165_v38, %v520_v34  ;;  %v403_v37 = vpop.f32.mrf.mxu0  ;;  %v443_v39 = vpop.f32.mrf.mxu1 }
  0xf0   :  { %v404_v40 = vadd.f32 %v1165_v38, %v403_v37  ;;  %v444_v41 = vadd.f32 %v1165_v38, %v443_v39 }
  0xf1   :  { %vm576_vm0 = vcmp.ge.f32.partialorder %v481_v35, 0.0  ;;  %v640_v42 = vmul.f32 0.1, %v481_v35  ;;  %vm592_vm1 = vcmp.ge.f32.partialorder %v521_v36, 0.0  ;;  %v656_v43 = vmul.f32 0.1, %v521_v36 }
  0xf2   :  { %vm545_vm2 = vcmp.ge.f32.partialorder %v404_v40, 0.0  ;;  %v609_v44 = vmul.f32 0.1, %v404_v40  ;;  %vm561_vm3 = vcmp.ge.f32.partialorder %v444_v41, 0.0  ;;  %v625_v45 = vmul.f32 0.1, %v444_v41 }
  0xf3   :  { %v704_v46 = vsel %vm576_vm0, %v481_v35, %v640_v42  ;;  %v720_v47 = vsel %vm592_vm1, %v521_v36, %v656_v43 }
  0xf4   :  { %768 = vst [vmem:[%s1426_s3 + $0x158] sm:$0xff] %v704_v46  ;;  %v673_v48 = vsel %vm545_vm2, %v404_v40, %v609_v44  ;;  %v689_v49 = vsel %vm561_vm3, %v444_v41, %v625_v45 }
  0xf5   :  { %784 = vst [vmem:[%s1426_s3 + $0x1d8] sm:$0xff] %v720_v47 }
  0xf6   :  { %737 = vst [vmem:[%s1426_s3 + $0x60] sm:$0xff] %v673_v48  ;;  %v483_v50 = vpop.f32.mrf.mxu2  ;;  %v523_v51 = vpop.f32.mrf.mxu3 }
  0xf7   :  { %753 = vst [vmem:[%s1426_s3 + $0xe0] sm:$0xff] %v689_v49  ;;  %v484_v52 = vadd.f32 %v1165_v38, %v483_v50  ;;  %v524_v53 = vadd.f32 %v1165_v38, %v523_v51  ;;  %v405_v54 = vpop.f32.mrf.mxu0  ;;  %v445_v55 = vpop.f32.mrf.mxu1 }
  0xf8   :  { %v406_v56 = vadd.f32 %v1165_v38, %v405_v54  ;;  %v446_v57 = vadd.f32 %v1165_v38, %v445_v55 }
  0xf9   :  { %vm577_vm4 = vcmp.ge.f32.partialorder %v484_v52, 0.0  ;;  %v641_v58 = vmul.f32 0.1, %v484_v52  ;;  %vm593_vm5 = vcmp.ge.f32.partialorder %v524_v53, 0.0  ;;  %v657_v59 = vmul.f32 0.1, %v524_v53 }
  0xfa   :  { %vm546_vm6 = vcmp.ge.f32.partialorder %v406_v56, 0.0  ;;  %v610_v60 = vmul.f32 0.1, %v406_v56  ;;  %vm562_vm7 = vcmp.ge.f32.partialorder %v446_v57, 0.0  ;;  %v626_v61 = vmul.f32 0.1, %v446_v57 }
  0xfb   :  { %v705_v62 = vsel %vm577_vm4, %v484_v52, %v641_v58  ;;  %v721_v63 = vsel %vm593_vm5, %v524_v53, %v657_v59 }
  0xfc   :  { %769 = vst [vmem:[%s1426_s3 + $0x160] sm:$0xff] %v705_v62  ;;  %v674_v0 = vsel %vm546_vm6, %v406_v56, %v610_v60  ;;  %v690_v1 = vsel %vm562_vm7, %v446_v57, %v626_v61 }
  0xfd   :  { %785 = vst [vmem:[%s1426_s3 + $0x1e0] sm:$0xff] %v721_v63 }
  0xfe   :  { %738 = vst [vmem:[%s1426_s3 + $0x68] sm:$0xff] %v674_v0  ;;  %v485_v2 = vpop.f32.mrf.mxu2  ;;  %v525_v3 = vpop.f32.mrf.mxu3 }
  0xff   :  { %754 = vst [vmem:[%s1426_s3 + $0xe8] sm:$0xff] %v690_v1  ;;  %v486_v4 = vadd.f32 %v1165_v38, %v485_v2  ;;  %v526_v5 = vadd.f32 %v1165_v38, %v525_v3  ;;  %v408_v6 = vpop.f32.mrf.mxu0  ;;  %v448_v7 = vpop.f32.mrf.mxu1 }
 0x100   :  { %v409_v8 = vadd.f32 %v1165_v38, %v408_v6  ;;  %v449_v9 = vadd.f32 %v1165_v38, %v448_v7 }
 0x101   :  { %vm578_vm8 = vcmp.ge.f32.partialorder %v486_v4, 0.0  ;;  %v642_v10 = vmul.f32 0.1, %v486_v4  ;;  %vm594_vm9 = vcmp.ge.f32.partialorder %v526_v5, 0.0  ;;  %v658_v11 = vmul.f32 0.1, %v526_v5 }
 0x102   :  { %vm547_vm10 = vcmp.ge.f32.partialorder %v409_v8, 0.0  ;;  %v611_v12 = vmul.f32 0.1, %v409_v8  ;;  %vm563_vm11 = vcmp.ge.f32.partialorder %v449_v9, 0.0  ;;  %v627_v13 = vmul.f32 0.1, %v449_v9 }
 0x103   :  { %v706_v14 = vsel %vm578_vm8, %v486_v4, %v642_v10  ;;  %v722_v15 = vsel %vm594_vm9, %v526_v5, %v658_v11 }
 0x104   :  { %770 = vst [vmem:[%s1426_s3 + $0x168] sm:$0xff] %v706_v14  ;;  %v675_v16 = vsel %vm547_vm10, %v409_v8, %v611_v12  ;;  %v691_v17 = vsel %vm563_vm11, %v449_v9, %v627_v13 }
 0x105   :  { %786 = vst [vmem:[%s1426_s3 + $0x1e8] sm:$0xff] %v722_v15 }
 0x106   :  { %739 = vst [vmem:[%s1426_s3 + $0x70] sm:$0xff] %v675_v16  ;;  %v488_v18 = vpop.f32.mrf.mxu2  ;;  %v528_v19 = vpop.f32.mrf.mxu3 }
 0x107   :  { %755 = vst [vmem:[%s1426_s3 + $0xf0] sm:$0xff] %v691_v17  ;;  %v489_v20 = vadd.f32 %v1165_v38, %v488_v18  ;;  %v529_v21 = vadd.f32 %v1165_v38, %v528_v19  ;;  %v410_v22 = vpop.f32.mrf.mxu0  ;;  %v450_v23 = vpop.f32.mrf.mxu1 }
 0x108   :  { %v411_v24 = vadd.f32 %v1165_v38, %v410_v22  ;;  %v451_v25 = vadd.f32 %v1165_v38, %v450_v23 }
 0x109   :  { %vm579_vm12 = vcmp.ge.f32.partialorder %v489_v20, 0.0  ;;  %v643_v26 = vmul.f32 0.1, %v489_v20  ;;  %vm595_vm13 = vcmp.ge.f32.partialorder %v529_v21, 0.0  ;;  %v659_v27 = vmul.f32 0.1, %v529_v21 }
 0x10a   :  { %vm548_vm14 = vcmp.ge.f32.partialorder %v411_v24, 0.0  ;;  %v612_v28 = vmul.f32 0.1, %v411_v24  ;;  %vm564_vm15 = vcmp.ge.f32.partialorder %v451_v25, 0.0  ;;  %v628_v29 = vmul.f32 0.1, %v451_v25 }
 0x10b   :  { %v707_v30 = vsel %vm579_vm12, %v489_v20, %v643_v26  ;;  %v723_v31 = vsel %vm595_vm13, %v529_v21, %v659_v27 }
 0x10c   :  { %771 = vst [vmem:[%s1426_s3 + $0x170] sm:$0xff] %v707_v30  ;;  %v676_v32 = vsel %vm548_vm14, %v411_v24, %v612_v28  ;;  %v692_v33 = vsel %vm564_vm15, %v451_v25, %v628_v29 }
 0x10d   :  { %787 = vst [vmem:[%s1426_s3 + $0x1f0] sm:$0xff] %v723_v31 }
 0x10e   :  { %740 = vst [vmem:[%s1426_s3 + $0x78] sm:$0xff] %v676_v32  ;;  %v490_v34 = vpop.f32.mrf.mxu2  ;;  %v530_v35 = vpop.f32.mrf.mxu3 }
 0x10f   :  { %756 = vst [vmem:[%s1426_s3 + $0xf8] sm:$0xff] %v692_v33  ;;  %v491_v36 = vadd.f32 %v1165_v38, %v490_v34  ;;  %v531_v37 = vadd.f32 %v1165_v38, %v530_v35 }
 0x111   :  { %vm580_vm0 = vcmp.ge.f32.partialorder %v491_v36, 0.0  ;;  %v644_v39 = vmul.f32 0.1, %v491_v36  ;;  %vm596_vm1 = vcmp.ge.f32.partialorder %v531_v37, 0.0  ;;  %v660_v40 = vmul.f32 0.1, %v531_v37 }
 0x113   :  { %v708_v41 = vsel %vm580_vm0, %v491_v36, %v644_v39  ;;  %v724_v42 = vsel %vm596_vm1, %v531_v37, %v660_v40 }
 0x114   :  { %772 = vst [vmem:[%s1426_s3 + $0x178] sm:$0xff] %v708_v41 }
 0x115   :  { %788 = vst [vmem:[%s1426_s3 + $0x1f8] sm:$0xff] %v724_v42 }

// kernel: yolo_v2_forward.4
= control target key start
LH: loop header
LB: loop body
LE: loop exit
PB: predicated region body
PF: predicated region fallthrough
CT: control target
= control target key end

     0   :  { %vm179_vm0 = vcmask 130048   ;;  %s739_s1 = inlined_call_operand.vmem [shape: bf16[144,128], index: 1, kind: input, shape index: {}]   ;;  %s740_s0 = inlined_call_operand.vmem [shape: bf16[128,144], index: 0, kind: input, shape index: {}]   ;;  %s741_s2 = inlined_call_operand.vmem [shape: f32[1,128], index: 2, kind: input, shape index: {}]   ;;  %s742_s3 = inlined_call_operand.vmem [shape: f32[128,128], index: 3, kind: output, shape index: {}]  }
   0x1   :  { %v501_v0 = vld [vmem:[%s739_s1 + $0x38] sm:$0xff]  ;;  %v502_v1 = vld [vmem:[%s739_s1 + $0x40] sm:$0xff]  ;;  %v374_v3 = vld [vmem:[%s740_s0 + $0x8] sm:$0xf0] }
   0x2   :  { %v478_v2 = vld [vmem:[%s740_s0 + $0x4] sm:$0xf]  ;;  %204 = vmatpush.bf16.msra.mxu0 %v501_v0  ;;  %503 = vmatpush.bf16.msra.mxu2 %v501_v0  ;;  %v500_v5 = vld [vmem:[%s739_s1 + $0x30] sm:$0xff]  ;;  %v499_v6 = vld [vmem:[%s739_s1 + $0x28] sm:$0xff] }
   0x3   :  { %v377_v4 = vor.u32 %v478_v2, %v374_v3  ;;  %260 = vmatpush.bf16.msra.mxu1 %v502_v1  ;;  %511 = vmatpush.bf16.msra.mxu3 %v502_v1  ;;  %v488_v7 = vld [vmem:[%s740_s0 + $0x54] sm:$0xf]  ;;  %v414_v8 = vld [vmem:[%s740_s0 + $0x58] sm:$0xf0]  ;;  %v498_v10 = vld [vmem:[%s739_s1 + $0x20] sm:$0xff] }
   0x4   :  { %v417_v9 = vor.u32 %v488_v7, %v414_v8  ;;  %v497_v11 = vld [vmem:[%s739_s1 + $0x18] sm:$0xff]  ;;  %v480_v12 = vld [vmem:[%s740_s0 + $0x14] sm:$0xf]  ;;  %v495_v16 = vld [vmem:[%s739_s1 + $0x8] sm:$0xff] }
   0x5   :  { %v382_v13 = vld [vmem:[%s740_s0 + $0x18] sm:$0xf0]  ;;  %v496_v15 = vld [vmem:[%s739_s1 + $0x10] sm:$0xff]  ;;  %v490_v17 = vld [vmem:[%s740_s0 + $0x64] sm:$0xf] }
   0x6   :  { %470 = vmatmul.msk.bf16.vlgmr.msra.gmra.mxu1 %vm179_vm0, %v377_v4  ;;  %205 = vmatpush.bf16.msra.mxu0 %v500_v5  ;;  %v385_v14 = vor.u32 %v480_v12, %v382_v13  ;;  %v422_v18 = vld [vmem:[%s740_s0 + $0x68] sm:$0xf0]  ;;  %v494_v20 = vld [vmem:[%s739_s1] sm:$0xff]  ;;  %v479_v22 = vld [vmem:[%s740_s0 + $0x4] sm:$0xf0] }
   0x7   :  { %504 = vmatpush.bf16.msra.mxu2 %v500_v5  ;;  %475 = vmatmul.msk.bf16.vlgmr.msra.gmra.mxu3 %vm179_vm0, %v417_v9  ;;  %v425_v19 = vor.u32 %v490_v17, %v422_v18  ;;  %v372_v21 = vld [vmem:[%s740_s0] sm:$0xf]  ;;  %v487_v24 = vld [vmem:[%s740_s0 + $0x44] sm:$0xf0]  ;;  %v482_v27 = vld [vmem:[%s740_s0 + $0x24] sm:$0xf] }
   0x8   :  { %v404_v23 = vld [vmem:[%s740_s0 + $0x40] sm:$0xf]  ;;  %v373_v25 = vor.u32 %v479_v22, %v372_v21  ;;  %v390_v28 = vld [vmem:[%s740_s0 + $0x28] sm:$0xf0]  ;;  %v492_v30 = vld [vmem:[%s740_s0 + $0x74] sm:$0xf] }
   0x9   :  { %v405_v26 = vor.u32 %v487_v24, %v404_v23  ;;  %v393_v29 = vor.u32 %v482_v27, %v390_v28  ;;  %v430_v31 = vld [vmem:[%s740_s0 + $0x78] sm:$0xf0]  ;;  %v380_v33 = vld [vmem:[%s740_s0 + $0x10] sm:$0xf]  ;;  %v481_v34 = vld [vmem:[%s740_s0 + $0x14] sm:$0xf0] }
   0xa   :  { %206 = vmatpush.bf16.msra.mxu0 %v499_v6  ;;  %v433_v32 = vor.u32 %v492_v30, %v430_v31  ;;  %v412_v35 = vld [vmem:[%s740_s0 + $0x50] sm:$0xf]  ;;  %v489_v36 = vld [vmem:[%s740_s0 + $0x54] sm:$0xf0]  ;;  %v381_v37 = vor.u32 %v481_v34, %v380_v33  ;;  %v484_v39 = vld [vmem:[%s740_s0 + $0x34] sm:$0xf] }
   0xb   :  { %505 = vmatpush.bf16.msra.mxu2 %v499_v6  ;;  %v413_v38 = vor.u32 %v489_v36, %v412_v35  ;;  %v398_v40 = vld [vmem:[%s740_s0 + $0x38] sm:$0xf0]  ;;  %v388_v42 = vld [vmem:[%s740_s0 + $0x20] sm:$0xf]  ;;  %v483_v43 = vld [vmem:[%s740_s0 + $0x24] sm:$0xf0] }
   0xc   :  { %v401_v41 = vor.u32 %v484_v39, %v398_v40  ;;  %v420_v44 = vld [vmem:[%s740_s0 + $0x60] sm:$0xf]  ;;  %v491_v45 = vld [vmem:[%s740_s0 + $0x64] sm:$0xf0]  ;;  %v389_v46 = vor.u32 %v483_v43, %v388_v42  ;;  %v486_v48 = vld [vmem:[%s740_s0 + $0x44] sm:$0xf] }
   0xd   :  { %v421_v47 = vor.u32 %v491_v45, %v420_v44  ;;  %v406_v49 = vld [vmem:[%s740_s0 + $0x48] sm:$0xf0]  ;;  %v396_v51 = vld [vmem:[%s740_s0 + $0x30] sm:$0xf]  ;;  %v485_v52 = vld [vmem:[%s740_s0 + $0x34] sm:$0xf0] }
   0xe   :  { %207 = vmatpush.bf16.msra.mxu0 %v498_v10  ;;  %v409_v50 = vor.u32 %v486_v48, %v406_v49  ;;  %v428_v53 = vld [vmem:[%s740_s0 + $0x70] sm:$0xf]  ;;  %v493_v54 = vld [vmem:[%s740_s0 + $0x74] sm:$0xf0]  ;;  %v397_v55 = vor.u32 %v485_v52, %v396_v51  ;;  %v667_v61 = vld [vmem:[%s741_s2] ss:$0 sm:$0xff] }
   0xf   :  { %506 = vmatpush.bf16.msra.mxu2 %v498_v10  ;;  %v429_v56 = vor.u32 %v493_v54, %v428_v53 }
  0x12   :  { %208 = vmatpush.bf16.msra.mxu0 %v497_v11 }
  0x13   :  { %507 = vmatpush.bf16.msra.mxu2 %v497_v11 }
  0x16   :  { %471 = vmatmul.msk.bf16.gmra.mxu1 %vm179_vm0, %v385_v14  ;;  %209 = vmatpush.bf16.msra.mxu0 %v496_v15 }
  0x17   :  { %508 = vmatpush.bf16.msra.mxu2 %v496_v15  ;;  %476 = vmatmul.msk.bf16.gmra.mxu3 %vm179_vm0, %v425_v19 }
  0x1a   :  { %210 = vmatpush.bf16.msra.mxu0 %v495_v16 }
  0x1b   :  { %509 = vmatpush.bf16.msra.mxu2 %v495_v16 }
  0x1e   :  { %211 = vmatpush.bf16.msra.mxu0 %v494_v20 }
  0x1f   :  { %510 = vmatpush.bf16.msra.mxu2 %v494_v20 }
  0x21   :  { %212 = vmatmul.bf16.vlgmr.msra.gmra.mxu0 %v373_v25 }
  0x22   :  { %232 = vmatmul.bf16.vlgmr.msra.gmra.mxu2 %v405_v26 }
  0x26   :  { %472 = vmatmul.msk.bf16.gmra.mxu1 %vm179_vm0, %v393_v29 }
  0x27   :  { %477 = vmatmul.msk.bf16.gmra.mxu3 %vm179_vm0, %v433_v32 }
  0x31   :  { %217 = vmatmul.bf16.gmra.mxu0 %v381_v37 }
  0x32   :  { %237 = vmatmul.bf16.gmra.mxu2 %v413_v38 }
  0x36   :  { %473 = vmatmul.msk.bf16.gmra.mxu1 %vm179_vm0, %v401_v41 }
  0x41   :  { %222 = vmatmul.bf16.gmra.mxu0 %v389_v46 }
  0x42   :  { %242 = vmatmul.bf16.gmra.mxu2 %v421_v47 }
  0x46   :  { %474 = vmatmul.msk.bf16.gmra.mxu1 %vm179_vm0, %v409_v50 }
  0x51   :  { %227 = vmatmul.bf16.gmra.mxu0 %v397_v55 }
  0x52   :  { %247 = vmatmul.bf16.gmra.mxu2 %v429_v56 }
  0x83   :  { %v262_v57 = vpop.f32.mrf.mxu1 }
  0x8a   :  { %v287_v12 = vpop.f32.mrf.mxu3 }
  0x8b   :  { %v264_v58 = vpop.f32.mrf.mxu1 }
  0x92   :  { %v289_v23 = vpop.f32.mrf.mxu3 }
  0x93   :  { %v267_v59 = vpop.f32.mrf.mxu1 }
  0x9a   :  { %v292_v37 = vpop.f32.mrf.mxu3 }
  0x9b   :  { %v269_v60 = vpop.f32.mrf.mxu1 }
  0x9e   :  { %v213_v62 = vpop.f32.mrf.mxu0 }
  0x9f   :  { %v214_v63 = vadd.f32 %v667_v61, %v213_v62 }
  0xa1   :  { %v263_v0 = vadd.f32 %v262_v57, %v214_v63 }
  0xa2   :  { %v294_v56 = vpop.f32.mrf.mxu3 }
  0xa3   :  { %vm302_vm1 = vcmp.ge.f32.partialorder %v263_v0, 0.0  ;;  %v318_v1 = vmul.f32 0.1, %v263_v0  ;;  %v272_v2 = vpop.f32.mrf.mxu1 }
  0xa5   :  { %v334_v3 = vsel %vm302_vm1, %v263_v0, %v318_v1  ;;  %v233_v4 = vpop.f32.mrf.mxu2 }
  0xa6   :  { %350 = vst [vmem:[%s742_s3] sm:$0xff] %v334_v3  ;;  %v215_v5 = vpop.f32.mrf.mxu0  ;;  %v234_v38 = vadd.f32 %v667_v61, %v233_v4 }
  0xa7   :  { %v216_v6 = vadd.f32 %v667_v61, %v215_v5 }
  0xa9   :  { %v265_v7 = vadd.f32 %v264_v58, %v216_v6 }
  0xab   :  { %vm303_vm2 = vcmp.ge.f32.partialorder %v265_v7, 0.0  ;;  %v319_v8 = vmul.f32 0.1, %v265_v7  ;;  %v274_v9 = vpop.f32.mrf.mxu1 }
  0xad   :  { %v335_v10 = vsel %vm303_vm2, %v265_v7, %v319_v8  ;;  %v235_v11 = vpop.f32.mrf.mxu2 }
  0xae   :  { %351 = vst [vmem:[%s742_s3 + $0x8] sm:$0xff] %v335_v10  ;;  %v218_v13 = vpop.f32.mrf.mxu0  ;;  %v236_v53 = vadd.f32 %v667_v61, %v235_v11  ;;  %v297_v10 = vpop.f32.mrf.mxu3 }
  0xaf   :  { %v219_v14 = vadd.f32 %v667_v61, %v218_v13 }
  0xb1   :  { %v268_v15 = vadd.f32 %v267_v59, %v219_v14 }
  0xb3   :  { %vm304_vm3 = vcmp.ge.f32.partialorder %v268_v15, 0.0  ;;  %v320_v16 = vmul.f32 0.1, %v268_v15  ;;  %v678_v17 = vpop.f32.mrf.mxu1 }
  0xb5   :  { %v336_v18 = vsel %vm304_vm3, %v268_v15, %v320_v16  ;;  %v238_v19 = vpop.f32.mrf.mxu2 }
  0xb6   :  { %352 = vst [vmem:[%s742_s3 + $0x10] sm:$0xff] %v336_v18  ;;  %v239_v20 = vadd.f32 %v667_v61, %v238_v19  ;;  %v220_v21 = vpop.f32.mrf.mxu0 }
  0xb7   :  { %v221_v22 = vadd.f32 %v667_v61, %v220_v21 }
  0xb8   :  { %v288_v24 = vadd.f32 %v287_v12, %v239_v20 }
  0xb9   :  { %v270_v25 = vadd.f32 %v269_v60, %v221_v22 }
  0xba   :  { %vm312_vm4 = vcmp.ge.f32.partialorder %v288_v24, 0.0  ;;  %v328_v26 = vmul.f32 0.1, %v288_v24 }
  0xbb   :  { %vm305_vm5 = vcmp.ge.f32.partialorder %v270_v25, 0.0  ;;  %v321_v27 = vmul.f32 0.1, %v270_v25  ;;  %v685_v28 = vpop.f32.mrf.mxu1 }
  0xbc   :  { %v344_v29 = vsel %vm312_vm4, %v288_v24, %v328_v26 }
  0xbd   :  { %360 = vst [vmem:[%s742_s3 + $0x50] sm:$0xff] %v344_v29  ;;  %v337_v30 = vsel %vm305_vm5, %v270_v25, %v321_v27  ;;  %v240_v31 = vpop.f32.mrf.mxu2 }
  0xbe   :  { %353 = vst [vmem:[%s742_s3 + $0x18] sm:$0xff] %v337_v30  ;;  %v241_v32 = vadd.f32 %v667_v61, %v240_v31  ;;  %v223_v33 = vpop.f32.mrf.mxu0 }
  0xbf   :  { %v224_v34 = vadd.f32 %v667_v61, %v223_v33 }
  0xc0   :  { %v290_v35 = vadd.f32 %v289_v23, %v241_v32  ;;  %v299_v23 = vpop.f32.mrf.mxu3 }
  0xc1   :  { %v273_v36 = vadd.f32 %v272_v2, %v224_v34 }
  0xc2   :  { %vm313_vm6 = vcmp.ge.f32.partialorder %v290_v35, 0.0  ;;  %v329_v39 = vmul.f32 0.1, %v290_v35 }
  0xc3   :  { %vm306_vm7 = vcmp.ge.f32.partialorder %v273_v36, 0.0  ;;  %v322_v40 = vmul.f32 0.1, %v273_v36  ;;  %v282_v41 = vpop.f32.mrf.mxu1 }
  0xc4   :  { %v345_v42 = vsel %vm313_vm6, %v290_v35, %v329_v39  ;;  %v283_v43 = vadd.f32 %v282_v41, %v234_v38 }
  0xc5   :  { %361 = vst [vmem:[%s742_s3 + $0x58] sm:$0xff] %v345_v42  ;;  %v338_v44 = vsel %vm306_vm7, %v273_v36, %v322_v40  ;;  %v243_v45 = vpop.f32.mrf.mxu2 }
  0xc6   :  { %354 = vst [vmem:[%s742_s3 + $0x20] sm:$0xff] %v338_v44  ;;  %vm310_vm8 = vcmp.ge.f32.partialorder %v283_v43, 0.0  ;;  %v326_v46 = vmul.f32 0.1, %v283_v43  ;;  %v244_v47 = vadd.f32 %v667_v61, %v243_v45  ;;  %v225_v48 = vpop.f32.mrf.mxu0 }
  0xc7   :  { %v226_v49 = vadd.f32 %v667_v61, %v225_v48 }
  0xc8   :  { %v342_v50 = vsel %vm310_vm8, %v283_v43, %v326_v46  ;;  %v293_v51 = vadd.f32 %v292_v37, %v244_v47 }
  0xc9   :  { %358 = vst [vmem:[%s742_s3 + $0x40] sm:$0xff] %v342_v50  ;;  %v275_v52 = vadd.f32 %v274_v9, %v226_v49 }
  0xca   :  { %vm314_vm9 = vcmp.ge.f32.partialorder %v293_v51, 0.0  ;;  %v330_v54 = vmul.f32 0.1, %v293_v51 }
  0xcb   :  { %vm307_vm10 = vcmp.ge.f32.partialorder %v275_v52, 0.0  ;;  %v323_v55 = vmul.f32 0.1, %v275_v52  ;;  %v284_v57 = vpop.f32.mrf.mxu1 }
  0xcc   :  { %v346_v58 = vsel %vm314_vm9, %v293_v51, %v330_v54  ;;  %v285_v59 = vadd.f32 %v284_v57, %v236_v53 }
  0xcd   :  { %362 = vst [vmem:[%s742_s3 + $0x60] sm:$0xff] %v346_v58  ;;  %v339_v60 = vsel %vm307_vm10, %v275_v52, %v323_v55  ;;  %v245_v62 = vpop.f32.mrf.mxu2 }
  0xce   :  { %355 = vst [vmem:[%s742_s3 + $0x28] sm:$0xff] %v339_v60  ;;  %vm311_vm11 = vcmp.ge.f32.partialorder %v285_v59, 0.0  ;;  %v327_v63 = vmul.f32 0.1, %v285_v59  ;;  %v246_v0 = vadd.f32 %v667_v61, %v245_v62  ;;  %v228_v1 = vpop.f32.mrf.mxu0 }
  0xcf   :  { %v229_v2 = vadd.f32 %v667_v61, %v228_v1 }
  0xd0   :  { %v343_v3 = vsel %vm311_vm11, %v285_v59, %v327_v63  ;;  %v295_v4 = vadd.f32 %v294_v56, %v246_v0 }
  0xd1   :  { %359 = vst [vmem:[%s742_s3 + $0x48] sm:$0xff] %v343_v3  ;;  %v278_v5 = vadd.f32 %v678_v17, %v229_v2 }
  0xd2   :  { %vm315_vm12 = vcmp.ge.f32.partialorder %v295_v4, 0.0  ;;  %v331_v6 = vmul.f32 0.1, %v295_v4 }
  0xd3   :  { %vm308_vm13 = vcmp.ge.f32.partialorder %v278_v5, 0.0  ;;  %v324_v7 = vmul.f32 0.1, %v278_v5 }
  0xd4   :  { %v347_v8 = vsel %vm315_vm12, %v295_v4, %v331_v6 }
  0xd5   :  { %363 = vst [vmem:[%s742_s3 + $0x68] sm:$0xff] %v347_v8  ;;  %v340_v9 = vsel %vm308_vm13, %v278_v5, %v324_v7  ;;  %v248_v11 = vpop.f32.mrf.mxu2 }
  0xd6   :  { %356 = vst [vmem:[%s742_s3 + $0x30] sm:$0xff] %v340_v9  ;;  %v249_v12 = vadd.f32 %v667_v61, %v248_v11  ;;  %v230_v13 = vpop.f32.mrf.mxu0 }
  0xd7   :  { %v231_v14 = vadd.f32 %v667_v61, %v230_v13 }
  0xd8   :  { %v298_v15 = vadd.f32 %v297_v10, %v249_v12 }
  0xd9   :  { %v280_v16 = vadd.f32 %v685_v28, %v231_v14 }
  0xda   :  { %vm316_vm14 = vcmp.ge.f32.partialorder %v298_v15, 0.0  ;;  %v332_v17 = vmul.f32 0.1, %v298_v15 }
  0xdb   :  { %vm309_vm15 = vcmp.ge.f32.partialorder %v280_v16, 0.0  ;;  %v325_v18 = vmul.f32 0.1, %v280_v16 }
  0xdc   :  { %v348_v19 = vsel %vm316_vm14, %v298_v15, %v332_v17 }
  0xdd   :  { %364 = vst [vmem:[%s742_s3 + $0x70] sm:$0xff] %v348_v19  ;;  %v341_v20 = vsel %vm309_vm15, %v280_v16, %v325_v18  ;;  %v250_v21 = vpop.f32.mrf.mxu2 }
  0xde   :  { %357 = vst [vmem:[%s742_s3 + $0x38] sm:$0xff] %v341_v20  ;;  %v251_v22 = vadd.f32 %v667_v61, %v250_v21 }
  0xe0   :  { %v300_v24 = vadd.f32 %v299_v23, %v251_v22 }
  0xe2   :  { %vm317_vm0 = vcmp.ge.f32.partialorder %v300_v24, 0.0  ;;  %v333_v25 = vmul.f32 0.1, %v300_v24 }
  0xe4   :  { %v349_v26 = vsel %vm317_vm0, %v300_v24, %v333_v25 }
  0xe5   :  { %365 = vst [vmem:[%s742_s3 + $0x78] sm:$0xff] %v349_v26 }

// kernel: yolo_v2_forward.5
= control target key start
LH: loop header
LB: loop body
LE: loop exit
PB: predicated region body
PF: predicated region fallthrough
CT: control target
= control target key end

     0   :  { %s3312_s3 = inlined_call_operand.vmem [shape: bf16[9,128,128], index: 3, kind: input, shape index: {}]   ;;  %s3313_s1 = inlined_call_operand.vmem [shape: f32[2,10,8,128], index: 1, kind: input, shape index: {}]   ;;  %s3314_s0 = inlined_call_operand.vmem [shape: f32[2,10,8,128], index: 0, kind: input, shape index: {}]   ;;  %s3315_s2 = inlined_call_operand.vmem [shape: f32[2,10,8,128], index: 2, kind: input, shape index: {}]   ;;  %s3316_s4 = inlined_call_operand.vmem [shape: bf16[128,128], index: 4, kind: input, shape index: {}]   ;;  %s3317_s5 = inlined_call_operand.vmem [shape: f32[1,128], index: 5, kind: input, shape index: {}]   ;;  %s3318_s6 = inlined_call_operand.vmem [shape: f32[2,8,8,128], index: 6, kind: output, shape index: {}]  }
   0x1   :  { %v2244_v0 = vld [vmem:[%s3312_s3 + $0x78] sm:$0xff]  ;;  %v2243_v2 = vld [vmem:[%s3312_s3 + $0x70] sm:$0xff]  ;;  %v2242_v4 = vld [vmem:[%s3312_s3 + $0x68] sm:$0xff] }
   0x2   :  { %v2236_v1 = vld [vmem:[%s3312_s3 + $0x38] sm:$0xff]  ;;  %2309 = vmatpush.bf16.msra.mxu2 %v2244_v0  ;;  %v2235_v3 = vld [vmem:[%s3312_s3 + $0x30] sm:$0xff]  ;;  %152 = vmatpush.bf16.msra.mxu0 %v2244_v0  ;;  %v2234_v5 = vld [vmem:[%s3312_s3 + $0x28] sm:$0xff] }
   0x3   :  { %2317 = vmatpush.bf16.msra.mxu3 %v2236_v1  ;;  %249 = vmatpush.bf16.msra.mxu1 %v2236_v1  ;;  %v2241_v6 = vld [vmem:[%s3312_s3 + $0x60] sm:$0xff]  ;;  %v2240_v8 = vld [vmem:[%s3312_s3 + $0x58] sm:$0xff]  ;;  %v2239_v10 = vld [vmem:[%s3312_s3 + $0x50] sm:$0xff] }
   0x4   :  { %v2233_v7 = vld [vmem:[%s3312_s3 + $0x20] sm:$0xff]  ;;  %v2232_v9 = vld [vmem:[%s3312_s3 + $0x18] sm:$0xff]  ;;  %v2231_v11 = vld [vmem:[%s3312_s3 + $0x10] sm:$0xff] }
   0x5   :  { %v2238_v12 = vld [vmem:[%s3312_s3 + $0x48] sm:$0xff]  ;;  %v2237_v14 = vld [vmem:[%s3312_s3 + $0x40] sm:$0xff]  ;;  %v71_v16 = vld [vmem:[%s3313_s1 + $0x50] sm:$0xff] }
   0x6   :  { %2310 = vmatpush.bf16.msra.mxu2 %v2243_v2  ;;  %153 = vmatpush.bf16.msra.mxu0 %v2243_v2  ;;  %v2230_v13 = vld [vmem:[%s3312_s3 + $0x8] sm:$0xff]  ;;  %v2229_v15 = vld [vmem:[%s3312_s3] sm:$0xff]  ;;  %v2421_v17 = vld [vmem:[%s3313_s1 + $0x58] sm:$0xff] }
   0x7   :  { %2318 = vmatpush.bf16.msra.mxu3 %v2235_v3  ;;  %250 = vmatpush.bf16.msra.mxu1 %v2235_v3  ;;  %v31_v18 = vld [vmem:[%s3314_s0 + $0x50] sm:$0xff]  ;;  %v2429_v19 = vld [vmem:[%s3314_s0 + $0x58] sm:$0xff]  ;;  %v63_v20 = vld [vmem:[%s3313_s1] sm:$0xff]  ;;  %v83_v26 = vpack.c.bf16 %v2421_v17, %v71_v16 }
   0x8   :  { %v2437_v21 = vld [vmem:[%s3313_s1 + $0x8] sm:$0xff]  ;;  %v23_v22 = vld [vmem:[%s3314_s0] sm:$0xff]  ;;  %v2252_v24 = vld [vmem:[%s3312_s3 + $0xb8] sm:$0xff]  ;;  %v43_v27 = vpack.c.bf16 %v2429_v19, %v31_v18 }
   0x9   :  { %v2445_v23 = vld [vmem:[%s3314_s0 + $0x8] sm:$0xff]  ;;  %v2260_v25 = vld [vmem:[%s3312_s3 + $0xf8] sm:$0xff]  ;;  %v79_v28 = vpack.c.bf16 %v2437_v21, %v63_v20  ;;  %v2251_v31 = vld [vmem:[%s3312_s3 + $0xb0] sm:$0xff] }
   0xa   :  { %2311 = vmatpush.bf16.msra.mxu2 %v2242_v4  ;;  %154 = vmatpush.bf16.msra.mxu0 %v2242_v4  ;;  %v39_v29 = vpack.c.bf16 %v2445_v23, %v23_v22  ;;  %v2268_v30 = vld [vmem:[%s3312_s3 + $0x138] sm:$0xff]  ;;  %v2259_v32 = vld [vmem:[%s3312_s3 + $0xf0] sm:$0xff]  ;;  %v2250_v35 = vld [vmem:[%s3312_s3 + $0xa8] sm:$0xff] }
   0xb   :  { %2319 = vmatpush.bf16.msra.mxu3 %v2234_v5  ;;  %251 = vmatpush.bf16.msra.mxu1 %v2234_v5  ;;  %v2267_v33 = vld [vmem:[%s3312_s3 + $0x130] sm:$0xff]  ;;  %v2276_v34 = vld [vmem:[%s3312_s3 + $0x178] sm:$0xff]  ;;  %v2258_v36 = vld [vmem:[%s3312_s3 + $0xe8] sm:$0xff] }
   0xc   :  { %v2266_v37 = vld [vmem:[%s3312_s3 + $0x128] sm:$0xff]  ;;  %v2249_v38 = vld [vmem:[%s3312_s3 + $0xa0] sm:$0xff]  ;;  %v2510_v44 = vld [vmem:[%s3313_s1 + $0x10] sm:$0xff] }
   0xd   :  { %v2257_v39 = vld [vmem:[%s3312_s3 + $0xe0] sm:$0xff]  ;;  %v2495_v41 = vld [vmem:[%s3313_s1 + $0x68] sm:$0xff]  ;;  %v2515_v45 = vld [vmem:[%s3313_s1 + $0x18] sm:$0xff] }
   0xe   :  { %2312 = vmatpush.bf16.msra.mxu2 %v2241_v6  ;;  %155 = vmatpush.bf16.msra.mxu0 %v2241_v6  ;;  %v2490_v40 = vld [vmem:[%s3313_s1 + $0x60] sm:$0xff]  ;;  %v2505_v43 = vld [vmem:[%s3314_s0 + $0x68] sm:$0xff]  ;;  %v2520_v46 = vld [vmem:[%s3314_s0 + $0x10] sm:$0xff]  ;;  %v2542_v53 = vpack.c.bf16 %v2515_v45, %v2510_v44 }
   0xf   :  { %2320 = vmatpush.bf16.msra.mxu3 %v2233_v7  ;;  %252 = vmatpush.bf16.msra.mxu1 %v2233_v7  ;;  %v2500_v42 = vld [vmem:[%s3314_s0 + $0x60] sm:$0xff]  ;;  %v2525_v47 = vld [vmem:[%s3314_s0 + $0x18] sm:$0xff]  ;;  %v84_v51 = vpack.c.bf16 %v2495_v41, %v2490_v40  ;;  %v2247_v56 = vld [vmem:[%s3312_s3 + $0x90] sm:$0xff] }
  0x10   :  { %v2265_v48 = vld [vmem:[%s3312_s3 + $0x120] sm:$0xff]  ;;  %v2248_v49 = vld [vmem:[%s3312_s3 + $0x98] sm:$0xff]  ;;  %v44_v52 = vpack.c.bf16 %v2505_v43, %v2500_v42  ;;  %v2546_v54 = vpack.c.bf16 %v2525_v47, %v2520_v46  ;;  %v2255_v57 = vld [vmem:[%s3312_s3 + $0xd0] sm:$0xff] }
  0x11   :  { %v2256_v50 = vld [vmem:[%s3312_s3 + $0xd8] sm:$0xff]  ;;  %v2275_v58 = vld [vmem:[%s3312_s3 + $0x170] sm:$0xff]  ;;  %v2274_v60 = vld [vmem:[%s3312_s3 + $0x168] sm:$0xff] }
  0x12   :  { %2313 = vmatpush.bf16.msra.mxu2 %v2240_v8  ;;  %156 = vmatpush.bf16.msra.mxu0 %v2240_v8  ;;  %v2264_v55 = vld [vmem:[%s3312_s3 + $0x118] sm:$0xff]  ;;  %v2263_v59 = vld [vmem:[%s3312_s3 + $0x110] sm:$0xff]  ;;  %v2246_v61 = vld [vmem:[%s3312_s3 + $0x88] sm:$0xff] }
  0x13   :  { %2321 = vmatpush.bf16.msra.mxu3 %v2232_v9  ;;  %253 = vmatpush.bf16.msra.mxu1 %v2232_v9  ;;  %v2254_v62 = vld [vmem:[%s3312_s3 + $0xc8] sm:$0xff]  ;;  %v2273_v63 = vld [vmem:[%s3312_s3 + $0x160] sm:$0xff]  ;;  %v2583_v1 = vld [vmem:[%s3313_s1 + $0x70] sm:$0xff] }
  0x14   :  { %v2262_v0 = vld [vmem:[%s3312_s3 + $0x108] sm:$0xff]  ;;  %v2245_v2 = vld [vmem:[%s3312_s3 + $0x80] sm:$0xff]  ;;  %v2594_v4 = vld [vmem:[%s3313_s1 + $0x78] sm:$0xff] }
  0x15   :  { %v2253_v3 = vld [vmem:[%s3312_s3 + $0xc0] sm:$0xff]  ;;  %v2599_v5 = vld [vmem:[%s3314_s0 + $0x70] sm:$0xff]  ;;  %v2604_v6 = vld [vmem:[%s3314_s0 + $0x78] sm:$0xff] }
  0x16   :  { %2314 = vmatpush.bf16.msra.mxu2 %v2239_v10  ;;  %157 = vmatpush.bf16.msra.mxu0 %v2239_v10  ;;  %v2609_v7 = vld [vmem:[%s3313_s1 + $0x20] sm:$0xff]  ;;  %v2614_v8 = vld [vmem:[%s3313_s1 + $0x28] sm:$0xff]  ;;  %v2271_v18 = vld [vmem:[%s3312_s3 + $0x150] sm:$0xff] }
  0x17   :  { %2322 = vmatpush.bf16.msra.mxu3 %v2231_v11  ;;  %254 = vmatpush.bf16.msra.mxu1 %v2231_v11  ;;  %v2619_v9 = vld [vmem:[%s3314_s0 + $0x20] sm:$0xff]  ;;  %v2624_v10 = vld [vmem:[%s3314_s0 + $0x28] sm:$0xff]  ;;  %v2272_v11 = vld [vmem:[%s3312_s3 + $0x158] sm:$0xff] }
  0x18   :  { %v2642_v16 = vpack.c.bf16 %v2624_v10, %v2619_v9  ;;  %v2284_v20 = vld [vmem:[%s3312_s3 + $0x1b8] sm:$0xff] }
  0x19   :  { %v2292_v22 = vld [vmem:[%s3312_s3 + $0x1f8] sm:$0xff] }
  0x1a   :  { %2315 = vmatpush.bf16.msra.mxu2 %v2238_v12  ;;  %158 = vmatpush.bf16.msra.mxu0 %v2238_v12  ;;  %v2261_v12 = vld [vmem:[%s3312_s3 + $0x100] sm:$0xff] }
  0x1b   :  { %2323 = vmatpush.bf16.msra.mxu3 %v2230_v13  ;;  %255 = vmatpush.bf16.msra.mxu1 %v2230_v13  ;;  %v85_v13 = vpack.c.bf16 %v2594_v4, %v2583_v1 }
  0x1e   :  { %2316 = vmatpush.bf16.msra.mxu2 %v2237_v14  ;;  %159 = vmatpush.bf16.msra.mxu0 %v2237_v14  ;;  %v45_v14 = vpack.c.bf16 %v2604_v6, %v2599_v5 }
  0x1f   :  { %2324 = vmatpush.bf16.msra.mxu3 %v2229_v15  ;;  %256 = vmatpush.bf16.msra.mxu1 %v2229_v15  ;;  %v2638_v15 = vpack.c.bf16 %v2614_v8, %v2609_v7 }
  0x21   :  { %180 = vmatmul.bf16.vlgmr.msra.gmra.mxu2 %v83_v26  ;;  %160 = vmatmul.bf16.vlgmr.msra.gmra.mxu0 %v79_v28  ;;  %v2269_v26 = vld [vmem:[%s3312_s3 + $0x140] sm:$0xff]  ;;  %v2672_v28 = vld [vmem:[%s3313_s1 + $0x88] sm:$0xff] }
  0x22   :  { %387 = vmatpush.bf16.msrb.mxu2 %v2252_v24  ;;  %277 = vmatmul.bf16.vlgmr.msra.gmra.mxu3 %v43_v27  ;;  %v2270_v24 = vld [vmem:[%s3312_s3 + $0x148] sm:$0xff]  ;;  %v2667_v27 = vld [vmem:[%s3313_s1 + $0x80] sm:$0xff] }
  0x23   :  { %542 = vmatpush.bf16.msrb.mxu3 %v2260_v25  ;;  %257 = vmatmul.bf16.vlgmr.msra.gmra.mxu1 %v39_v29  ;;  %v2300_v25 = vld [vmem:[%s3312_s3 + $0x238] sm:$0xff]  ;;  %v2677_v29 = vld [vmem:[%s3314_s0 + $0x80] sm:$0xff] }
  0x24   :  { %697 = vmatpush.bf16.msrb.mxu0 %v2268_v30  ;;  %852 = vmatpush.bf16.msrb.mxu1 %v2276_v34  ;;  %v2682_v30 = vld [vmem:[%s3314_s0 + $0x88] sm:$0xff]  ;;  %v2698_v34 = vld [vmem:[%s3314_s0 + $0x38] sm:$0xff] }
  0x26   :  { %388 = vmatpush.bf16.msrb.mxu2 %v2251_v31  ;;  %v69_v31 = vld [vmem:[%s3313_s1 + $0x30] sm:$0xff] }
  0x27   :  { %543 = vmatpush.bf16.msrb.mxu3 %v2259_v32  ;;  %v2690_v32 = vld [vmem:[%s3313_s1 + $0x38] sm:$0xff] }
  0x28   :  { %698 = vmatpush.bf16.msrb.mxu0 %v2267_v33  ;;  %853 = vmatpush.bf16.msrb.mxu1 %v2275_v58  ;;  %v29_v33 = vld [vmem:[%s3314_s0 + $0x30] sm:$0xff] }
  0x2a   :  { %389 = vmatpush.bf16.msrb.mxu2 %v2250_v35  ;;  %v86_v35 = vpack.c.bf16 %v2672_v28, %v2667_v27 }
  0x2b   :  { %544 = vmatpush.bf16.msrb.mxu3 %v2258_v36  ;;  %v2704_v36 = vpack.c.bf16 %v2682_v30, %v2677_v29 }
  0x2c   :  { %699 = vmatpush.bf16.msrb.mxu0 %v2266_v37  ;;  %854 = vmatpush.bf16.msrb.mxu1 %v2274_v60  ;;  %v2707_v37 = vpack.c.bf16 %v2690_v32, %v69_v31  ;;  %v2290_v60 = vld [vmem:[%s3312_s3 + $0x1e8] sm:$0xff] }
  0x2e   :  { %390 = vmatpush.bf16.msrb.mxu2 %v2249_v38  ;;  %v2710_v38 = vpack.c.bf16 %v2698_v34, %v29_v33 }
  0x2f   :  { %545 = vmatpush.bf16.msrb.mxu3 %v2257_v39  ;;  %v2283_v39 = vld [vmem:[%s3312_s3 + $0x1b0] sm:$0xff] }
  0x30   :  { %700 = vmatpush.bf16.msrb.mxu0 %v2265_v48  ;;  %855 = vmatpush.bf16.msrb.mxu1 %v2273_v63  ;;  %v2291_v48 = vld [vmem:[%s3312_s3 + $0x1f0] sm:$0xff] }
  0x31   :  { %185 = vmatmul.bf16.gmra.mxu2 %v84_v51  ;;  %165 = vmatmul.bf16.gmra.mxu0 %v2542_v53  ;;  %v299_v51 = vld [vmem:[%s3315_s2 + $0x8] sm:$0xff] }
  0x32   :  { %391 = vmatpush.bf16.msrb.mxu2 %v2248_v49  ;;  %282 = vmatmul.bf16.gmra.mxu3 %v44_v52  ;;  %v2299_v49 = vld [vmem:[%s3312_s3 + $0x230] sm:$0xff] }
  0x33   :  { %546 = vmatpush.bf16.msrb.mxu3 %v2256_v50  ;;  %262 = vmatmul.bf16.gmra.mxu1 %v2546_v54  ;;  %v298_v50 = vld [vmem:[%s3315_s2] sm:$0xff]  ;;  %v1942_v52 = vld [vmem:[%s3315_s2 + $0x10] sm:$0xff] }
  0x34   :  { %701 = vmatpush.bf16.msrb.mxu0 %v2264_v55  ;;  %856 = vmatpush.bf16.msrb.mxu1 %v2272_v11  ;;  %v314_v55 = vpack.c.bf16 %v299_v51, %v298_v50  ;;  %v779_v58 = vpack.c.bf16 %v1942_v52, %v299_v51  ;;  %v626_v11 = vpack.c.bf16 %v69_v31, %v2614_v8  ;;  %v2296_v8 = vld [vmem:[%s3312_s3 + $0x218] sm:$0xff] }
  0x35   :  { %v473_v50 = vpack.c.bf16 %v2500_v42, %v2429_v19  ;;  %v628_v51 = vpack.c.bf16 %v2490_v40, %v2421_v17  ;;  %v2286_v19 = vld [vmem:[%s3312_s3 + $0x1c8] sm:$0xff] }
  0x36   :  { %392 = vmatpush.bf16.msrb.mxu2 %v2247_v56  ;;  %v469_v56 = vpack.c.bf16 %v2520_v46, %v2445_v23  ;;  %v2298_v23 = vld [vmem:[%s3312_s3 + $0x228] sm:$0xff] }
  0x37   :  { %547 = vmatpush.bf16.msrb.mxu3 %v2255_v57  ;;  %v624_v57 = vpack.c.bf16 %v2510_v44, %v2437_v21  ;;  %v301_v21 = vld [vmem:[%s3315_s2 + $0x18] sm:$0xff]  ;;  %v1944_v44 = vld [vmem:[%s3315_s2 + $0x20] sm:$0xff] }
  0x38   :  { %702 = vmatpush.bf16.msrb.mxu0 %v2263_v59  ;;  %857 = vmatpush.bf16.msrb.mxu1 %v2271_v18  ;;  %v2282_v59 = vld [vmem:[%s3312_s3 + $0x1a8] sm:$0xff]  ;;  %v2752_v46 = vpack.c.bf16 %v301_v21, %v1942_v52  ;;  %v780_v63 = vpack.c.bf16 %v1944_v44, %v301_v21  ;;  %v2794_v18 = vld [vmem:[%s3314_s0 + $0x40] sm:$0xff] }
  0x39   :  { %v309_v21 = vld [vmem:[%s3315_s2 + $0x68] sm:$0xff] }
  0x3a   :  { %393 = vmatpush.bf16.msrb.mxu2 %v2246_v61  ;;  %v470_v61 = vpack.c.bf16 %v2619_v9, %v2525_v47  ;;  %v2297_v47 = vld [vmem:[%s3312_s3 + $0x220] sm:$0xff]  ;;  %v471_v9 = vpack.c.bf16 %v29_v33, %v2624_v10  ;;  %v305_v10 = vld [vmem:[%s3315_s2 + $0x38] sm:$0xff]  ;;  %v2279_v33 = vld [vmem:[%s3312_s3 + $0x190] sm:$0xff] }
  0x3b   :  { %548 = vmatpush.bf16.msrb.mxu3 %v2254_v62  ;;  %v625_v62 = vpack.c.bf16 %v2609_v7, %v2515_v45  ;;  %v303_v45 = vld [vmem:[%s3315_s2 + $0x28] sm:$0xff] }
  0x3c   :  { %703 = vmatpush.bf16.msrb.mxu0 %v2262_v0  ;;  %858 = vmatpush.bf16.msrb.mxu1 %v2270_v24  ;;  %v2281_v0 = vld [vmem:[%s3312_s3 + $0x1a0] sm:$0xff]  ;;  %v2774_v7 = vpack.c.bf16 %v303_v45, %v1944_v44  ;;  %v1952_v44 = vld [vmem:[%s3315_s2 + $0x70] sm:$0xff] }
  0x3e   :  { %394 = vmatpush.bf16.msrb.mxu2 %v2245_v2  ;;  %v2289_v2 = vld [vmem:[%s3312_s3 + $0x1e0] sm:$0xff] }
  0x3f   :  { %549 = vmatpush.bf16.msrb.mxu3 %v2253_v3  ;;  %v1946_v3 = vld [vmem:[%s3315_s2 + $0x30] sm:$0xff] }
  0x40   :  { %704 = vmatpush.bf16.msrb.mxu0 %v2261_v12  ;;  %859 = vmatpush.bf16.msrb.mxu1 %v2269_v26  ;;  %v781_v12 = vpack.c.bf16 %v1946_v3, %v303_v45  ;;  %v2806_v24 = vpack.c.bf16 %v305_v10, %v1946_v3  ;;  %v784_v45 = vpack.c.bf16 %v1952_v44, %v309_v21 }
  0x41   :  { %190 = vmatmul.bf16.gmra.mxu2 %v85_v13  ;;  %170 = vmatmul.bf16.gmra.mxu0 %v2638_v15  ;;  %v2280_v13 = vld [vmem:[%s3312_s3 + $0x198] sm:$0xff] }
  0x42   :  { %287 = vmatmul.bf16.gmra.mxu3 %v45_v14  ;;  %1007 = vmatpush.bf16.msra.mxu2 %v2284_v20  ;;  %v2288_v14 = vld [vmem:[%s3312_s3 + $0x1d8] sm:$0xff]  ;;  %v2799_v20 = vld [vmem:[%s3313_s1 + $0x40] sm:$0xff] }
  0x43   :  { %267 = vmatmul.bf16.gmra.mxu1 %v2642_v16  ;;  %1162 = vmatpush.bf16.msra.mxu3 %v2292_v22  ;;  %v2804_v22 = vld [vmem:[%s3315_s2 + $0x40] sm:$0xff]  ;;  %v627_v26 = vpack.c.bf16 %v2799_v20, %v2690_v32  ;;  %v2295_v32 = vld [vmem:[%s3312_s3 + $0x210] sm:$0xff] }
  0x44   :  { %1317 = vmatpush.bf16.msra.mxu0 %v2300_v25  ;;  %v472_v25 = vpack.c.bf16 %v2794_v18, %v2698_v34  ;;  %v782_v31 = vpack.c.bf16 %v2804_v22, %v305_v10  ;;  %v306_v34 = vld [vmem:[%s3315_s2 + $0x50] sm:$0xff]  ;;  %v311_v10 = vld [vmem:[%s3315_s2 + $0x78] sm:$0xff] }
  0x46   :  { %1008 = vmatpush.bf16.msra.mxu2 %v2283_v39  ;;  %v307_v39 = vld [vmem:[%s3315_s2 + $0x58] sm:$0xff] }
  0x47   :  { %1163 = vmatpush.bf16.msra.mxu3 %v2291_v48  ;;  %v1950_v48 = vld [vmem:[%s3315_s2 + $0x60] sm:$0xff] }
  0x48   :  { %1318 = vmatpush.bf16.msra.mxu0 %v2299_v49  ;;  %v318_v49 = vpack.c.bf16 %v307_v39, %v306_v34  ;;  %v783_v52 = vpack.c.bf16 %v1950_v48, %v307_v39  ;;  %v630_v34 = vpack.c.bf16 %v2667_v27, %v2594_v4  ;;  %v313_v4 = vld [vmem:[%s3315_s2 + $0x88] sm:$0xff]  ;;  %v2914_v27 = vld [vmem:[%s3314_s0 + $0x90] sm:$0xff] }
  0x4a   :  { %1009 = vmatpush.bf16.msra.mxu2 %v2282_v59 }
  0x4b   :  { %1164 = vmatpush.bf16.msra.mxu3 %v2290_v60 }
  0x4c   :  { %1319 = vmatpush.bf16.msra.mxu0 %v2298_v23  ;;  %v2294_v23 = vld [vmem:[%s3312_s3 + $0x208] sm:$0xff] }
  0x4e   :  { %1010 = vmatpush.bf16.msra.mxu2 %v2281_v0  ;;  %v2861_v0 = vpack.c.bf16 %v309_v21, %v1950_v48  ;;  %v476_v21 = vpack.c.bf16 %v2914_v27, %v2682_v30 }
  0x4f   :  { %1165 = vmatpush.bf16.msra.mxu3 %v2289_v2  ;;  %v474_v2 = vpack.c.bf16 %v2599_v5, %v2505_v43  ;;  %v2285_v43 = vld [vmem:[%s3312_s3 + $0x1c0] sm:$0xff] }
  0x50   :  { %1320 = vmatpush.bf16.msra.mxu0 %v2297_v47  ;;  %v629_v47 = vpack.c.bf16 %v2583_v1, %v2495_v41 }
  0x51   :  { %195 = vmatmul.bf16.gmra.mxu2 %v86_v35  ;;  %175 = vmatmul.bf16.gmra.mxu0 %v2707_v37  ;;  %v2287_v35 = vld [vmem:[%s3312_s3 + $0x1d0] sm:$0xff] }
  0x52   :  { %292 = vmatmul.bf16.gmra.mxu3 %v2704_v36  ;;  %1011 = vmatpush.bf16.msra.mxu2 %v2280_v13 }
  0x53   :  { %272 = vmatmul.bf16.gmra.mxu1 %v2710_v38  ;;  %1166 = vmatpush.bf16.msra.mxu3 %v2288_v14 }
  0x54   :  { %1321 = vmatpush.bf16.msra.mxu0 %v2296_v8  ;;  %v2293_v8 = vld [vmem:[%s3312_s3 + $0x200] sm:$0xff] }
  0x56   :  { %1012 = vmatpush.bf16.msra.mxu2 %v2279_v33 }
  0x57   :  { %1167 = vmatpush.bf16.msra.mxu3 %v2287_v35  ;;  %v2893_v35 = vpack.c.bf16 %v311_v10, %v1952_v44 }
  0x58   :  { %1322 = vmatpush.bf16.msra.mxu0 %v2295_v32  ;;  %v475_v32 = vpack.c.bf16 %v2677_v29, %v2604_v6  ;;  %v2919_v29 = vld [vmem:[%s3313_s1 + $0x90] sm:$0xff] }
  0x59   :  { %v631_v44 = vpack.c.bf16 %v2919_v29, %v2672_v28 }
  0x5b   :  { %1168 = vmatpush.bf16.msra.mxu3 %v2286_v19 }
  0x5c   :  { %1323 = vmatpush.bf16.msra.mxu0 %v2294_v23 }
  0x5f   :  { %1169 = vmatpush.bf16.msra.mxu3 %v2285_v43 }
  0x60   :  { %1324 = vmatpush.bf16.msra.mxu0 %v2293_v8 }
  0x61   :  { %395 = vmatmul.bf16.vlgmr.msrb.gmra.mxu2 %v314_v55  ;;  %705 = vmatmul.bf16.vlgmr.msrb.gmra.mxu0 %v624_v57 }
  0x62   :  { %550 = vmatmul.bf16.vlgmr.msrb.gmra.mxu3 %v469_v56 }
  0x63   :  { %860 = vmatmul.bf16.vlgmr.msrb.gmra.mxu1 %v779_v58  ;;  %v2278_v58 = vld [vmem:[%s3312_s3 + $0x188] sm:$0xff] }
  0x64   :  { %1013 = vmatpush.bf16.msra.mxu2 %v2278_v58  ;;  %v2924_v58 = vld [vmem:[%s3315_s2 + $0x90] sm:$0xff] }
  0x71   :  { %400 = vmatmul.bf16.gmra.mxu2 %v2752_v46  ;;  %710 = vmatmul.bf16.gmra.mxu0 %v625_v62 }
  0x72   :  { %555 = vmatmul.bf16.gmra.mxu3 %v470_v61 }
  0x73   :  { %865 = vmatmul.bf16.gmra.mxu1 %v780_v63 }
  0x81   :  { %405 = vmatmul.bf16.gmra.mxu2 %v2774_v7  ;;  %715 = vmatmul.bf16.gmra.mxu0 %v626_v11 }
  0x82   :  { %560 = vmatmul.bf16.gmra.mxu3 %v471_v9 }
  0x83   :  { %870 = vmatmul.bf16.gmra.mxu1 %v781_v12  ;;  %v2277_v12 = vld [vmem:[%s3312_s3 + $0x180] sm:$0xff] }
  0x84   :  { %1014 = vmatpush.bf16.msra.mxu2 %v2277_v12 }
  0x91   :  { %410 = vmatmul.bf16.gmra.mxu2 %v2806_v24  ;;  %720 = vmatmul.bf16.gmra.mxu0 %v627_v26 }
  0x92   :  { %565 = vmatmul.bf16.gmra.mxu3 %v472_v25  ;;  %v1954_v25 = vld [vmem:[%s3315_s2 + $0x80] sm:$0xff] }
  0x93   :  { %875 = vmatmul.bf16.gmra.mxu1 %v782_v31  ;;  %v785_v39 = vpack.c.bf16 %v1954_v25, %v311_v10  ;;  %v2928_v23 = vpack.c.bf16 %v313_v4, %v1954_v25 }
  0x9e   :  { %v161_v55 = vpop.f32.mrf.mxu0 }
  0xa0   :  { %v258_v56 = vpop.f32.mrf.mxu1 }
  0xa1   :  { %v2836_v57 = vadd.f32 %v258_v56, %v161_v55  ;;  %415 = vmatmul.bf16.gmra.mxu2 %v318_v49  ;;  %725 = vmatmul.bf16.gmra.mxu0 %v628_v51 }
  0xa2   :  { %570 = vmatmul.bf16.gmra.mxu3 %v473_v50 }
  0xa3   :  { %880 = vmatmul.bf16.gmra.mxu1 %v783_v52 }
  0xa4   :  { %v181_v42 = vpop.f32.mrf.mxu2 }
  0xa5   :  { %v278_v17 = vpop.f32.mrf.mxu3 }
  0xa6   :  { %v2844_v40 = vadd.f32 %v278_v17, %v181_v42  ;;  %v2846_v59 = vpop.f32.mrf.mxu0 }
  0xa8   :  { %v2848_v60 = vpop.f32.mrf.mxu1 }
  0xac   :  { %v183_v61 = vpop.f32.mrf.mxu2 }
  0xad   :  { %v280_v62 = vpop.f32.mrf.mxu3 }
  0xae   :  { %v2859_v63 = vadd.f32 %v280_v62, %v183_v61  ;;  %v166_v3 = vpop.f32.mrf.mxu0  ;;  %v786_v61 = vpack.c.bf16 %v2924_v58, %v313_v4 }
  0xb0   :  { %v263_v9 = vpop.f32.mrf.mxu1 }
  0xb1   :  { %v2867_v11 = vadd.f32 %v263_v9, %v166_v3  ;;  %420 = vmatmul.bf16.gmra.mxu2 %v2861_v0  ;;  %730 = vmatmul.bf16.gmra.mxu0 %v629_v47 }
  0xb2   :  { %575 = vmatmul.bf16.gmra.mxu3 %v474_v2 }
  0xb3   :  { %885 = vmatmul.bf16.gmra.mxu1 %v784_v45 }
  0xb4   :  { %v186_v41 = vpop.f32.mrf.mxu2 }
  0xb5   :  { %v283_v1 = vpop.f32.mrf.mxu3 }
  0xb6   :  { %v2876_v5 = vadd.f32 %v283_v1, %v186_v41  ;;  %v2878_v13 = vpop.f32.mrf.mxu0 }
  0xb8   :  { %v2880_v14 = vpop.f32.mrf.mxu1 }
  0xbc   :  { %v188_v26 = vpop.f32.mrf.mxu2 }
  0xbd   :  { %v285_v31 = vpop.f32.mrf.mxu3 }
  0xbe   :  { %v2891_v33 = vadd.f32 %v285_v31, %v188_v26  ;;  %v171_v48 = vpop.f32.mrf.mxu0 }
  0xc0   :  { %v268_v49 = vpop.f32.mrf.mxu1 }
  0xc1   :  { %v2899_v50 = vadd.f32 %v268_v49, %v171_v48  ;;  %425 = vmatmul.bf16.gmra.mxu2 %v2893_v35  ;;  %735 = vmatmul.bf16.gmra.mxu0 %v630_v34  ;;  %v261_v48 = vadd.f32 %v2848_v60, %v2846_v59 }
  0xc2   :  { %580 = vmatmul.bf16.gmra.mxu3 %v475_v32 }
  0xc3   :  { %890 = vmatmul.bf16.gmra.mxu1 %v785_v39 }
  0xc4   :  { %v191_v51 = vpop.f32.mrf.mxu2 }
  0xc5   :  { %v288_v52 = vpop.f32.mrf.mxu3 }
  0xc6   :  { %v2902_v55 = vadd.f32 %v288_v52, %v191_v51  ;;  %v2904_v56 = vpop.f32.mrf.mxu0 }
  0xc8   :  { %v2906_v6 = vpop.f32.mrf.mxu1 }
  0xcc   :  { %v193_v19 = vpop.f32.mrf.mxu2 }
  0xcd   :  { %v290_v42 = vpop.f32.mrf.mxu3 }
  0xce   :  { %v2926_v17 = vadd.f32 %v290_v42, %v193_v19  ;;  %v176_v62 = vpop.f32.mrf.mxu0 }
  0xd0   :  { %v273_v2 = vpop.f32.mrf.mxu1 }
  0xd1   :  { %v2935_v47 = vadd.f32 %v273_v2, %v176_v62  ;;  %430 = vmatmul.bf16.gmra.mxu2 %v2928_v23  ;;  %740 = vmatmul.bf16.gmra.mxu0 %v631_v44 }
  0xd2   :  { %585 = vmatmul.bf16.gmra.mxu3 %v476_v21 }
  0xd3   :  { %895 = vmatmul.bf16.gmra.mxu1 %v786_v61  ;;  %v266_v61 = vadd.f32 %v2880_v14, %v2878_v13 }
  0xd4   :  { %v196_v45 = vpop.f32.mrf.mxu2 }
  0xd5   :  { %v293_v3 = vpop.f32.mrf.mxu3 }
  0xd6   :  { %v2938_v9 = vadd.f32 %v293_v3, %v196_v45  ;;  %v2940_v12 = vpop.f32.mrf.mxu0 }
  0xd8   :  { %v2942_v30 = vpop.f32.mrf.mxu1 }
  0xdc   :  { %v198_v28 = vpop.f32.mrf.mxu2 }
  0xdd   :  { %v295_v43 = vpop.f32.mrf.mxu3 }
  0xde   :  { %v2944_v41 = vadd.f32 %v295_v43, %v198_v28  ;;  %v706_v1 = vpop.f32.mrf.mxu0 }
  0xe0   :  { %v861_v8 = vpop.f32.mrf.mxu1 }
  0xe1   :  { %1015 = vmatmul.bf16.vlgmr.msra.gmra.mxu2 %v2546_v54  ;;  %1325 = vmatmul.bf16.vlgmr.msra.gmra.mxu0 %v2752_v46 }
  0xe2   :  { %1170 = vmatmul.bf16.vlgmr.msra.gmra.mxu3 %v2542_v53 }
  0xe4   :  { %v396_v10 = vpop.f32.mrf.mxu2 }
  0xe5   :  { %v551_v25 = vpop.f32.mrf.mxu3  ;;  %v436_v26 = vadd.f32 %v396_v10, %v2836_v57 }
  0xe6   :  { %v708_v32 = vpop.f32.mrf.mxu0 }
  0xe7   :  { %v591_v31 = vadd.f32 %v551_v25, %v436_v26  ;;  %v2012_v25 = vld [vmem:[%s3314_s0 + $0x48] sm:$0xff] }
  0xe8   :  { %v2950_v39 = vpop.f32.mrf.mxu1 }
  0xe9   :  { %v746_v34 = vadd.f32 %v706_v1, %v591_v31 }
  0xeb   :  { %v2954_v49 = vadd.f32 %v861_v8, %v746_v34  ;;  %v937_v34 = vpack.c.bf16 %v2012_v25, %v2794_v18  ;;  %v2013_v18 = vld [vmem:[%s3314_s0 + $0x60] sm:$0xff] }
  0xec   :  { %v398_v51 = vpop.f32.mrf.mxu2 }
  0xed   :  { %v553_v54 = vpop.f32.mrf.mxu3  ;;  %v437_v52 = vadd.f32 %v398_v51, %v261_v48 }
  0xee   :  { %v711_v4 = vpop.f32.mrf.mxu0 }
  0xef   :  { %v592_v53 = vadd.f32 %v553_v54, %v437_v52 }
  0xf0   :  { %v866_v57 = vpop.f32.mrf.mxu1 }
  0xf1   :  { %1020 = vmatmul.bf16.gmra.mxu2 %v2642_v16  ;;  %v2958_v46 = vadd.f32 %v708_v32, %v592_v53  ;;  %1330 = vmatmul.bf16.gmra.mxu0 %v2774_v7 }
  0xf2   :  { %1175 = vmatmul.bf16.gmra.mxu3 %v2638_v15 }
  0xf4   :  { %v401_v19 = vpop.f32.mrf.mxu2 }
  0xf5   :  { %v556_v42 = vpop.f32.mrf.mxu3  ;;  %v438_v59 = vadd.f32 %v401_v19, %v2867_v11 }
  0xf6   :  { %v713_v21 = vpop.f32.mrf.mxu0 }
  0xf7   :  { %v593_v60 = vadd.f32 %v556_v42, %v438_v59  ;;  %v276_v59 = vadd.f32 %v2942_v30, %v2940_v12  ;;  %v2015_v30 = vld [vmem:[%s3314_s0 + $0x70] sm:$0xff] }
  0xf8   :  { %v2966_v45 = vpop.f32.mrf.mxu1 }
  0xf9   :  { %v748_v44 = vadd.f32 %v711_v4, %v593_v60 }
  0xfb   :  { %v2964_v62 = vadd.f32 %v866_v57, %v748_v44 }
  0xfc   :  { %v403_v16 = vpop.f32.mrf.mxu2 }
  0xfd   :  { %v558_v2 = vpop.f32.mrf.mxu3  ;;  %v439_v15 = vadd.f32 %v403_v16, %v266_v61 }
  0xfe   :  { %v716_v7 = vpop.f32.mrf.mxu0 }
  0xff   :  { %v594_v3 = vadd.f32 %v558_v2, %v439_v15 }
 0x100   :  { %v871_v8 = vpop.f32.mrf.mxu1 }
 0x101   :  { %1025 = vmatmul.bf16.gmra.mxu2 %v2710_v38  ;;  %v2970_v11 = vadd.f32 %v713_v21, %v594_v3  ;;  %1335 = vmatmul.bf16.gmra.mxu0 %v2806_v24  ;;  %v271_v38 = vadd.f32 %v2906_v6, %v2904_v56 }
 0x102   :  { %1180 = vmatmul.bf16.gmra.mxu3 %v2707_v37  ;;  %v2076_v37 = vld [vmem:[%s3313_s1 + $0x48] sm:$0xff] }
 0x103   :  { %v1092_v48 = vpack.c.bf16 %v2076_v37, %v2799_v20  ;;  %v2014_v20 = vld [vmem:[%s3314_s0 + $0x68] sm:$0xff] }
 0x104   :  { %v406_v28 = vpop.f32.mrf.mxu2  ;;  %v938_v61 = vpack.c.bf16 %v2014_v20, %v2013_v18 }
 0x105   :  { %v561_v43 = vpop.f32.mrf.mxu3  ;;  %v440_v13 = vadd.f32 %v406_v28, %v2899_v50  ;;  %v2140_v50 = vld [vmem:[%s3315_s2 + $0x48] sm:$0xff] }
 0x106   :  { %v718_v1 = vpop.f32.mrf.mxu0  ;;  %v1247_v51 = vpack.c.bf16 %v2140_v50, %v2804_v22  ;;  %v2077_v22 = vld [vmem:[%s3313_s1 + $0x60] sm:$0xff] }
 0x107   :  { %v595_v14 = vadd.f32 %v561_v43, %v440_v13 }
 0x109   :  { %v750_v10 = vadd.f32 %v716_v7, %v595_v14 }
 0x10b   :  { %v2982_v24 = vadd.f32 %v871_v8, %v750_v10 }
 0x10c   :  { %v408_v26 = vpop.f32.mrf.mxu2 }
 0x10d   :  { %v563_v31 = vpop.f32.mrf.mxu3  ;;  %v441_v32 = vadd.f32 %v408_v26, %v271_v38 }
 0x10e   :  { %v721_v52 = vpop.f32.mrf.mxu0 }
 0x10f   :  { %v596_v54 = vadd.f32 %v563_v31, %v441_v32 }
 0x111   :  { %1030 = vmatmul.bf16.gmra.mxu2 %v937_v34  ;;  %v2990_v56 = vadd.f32 %v718_v1, %v596_v54  ;;  %1340 = vmatmul.bf16.gmra.mxu0 %v1247_v51  ;;  %v2016_v1 = vld [vmem:[%s3314_s0 + $0x78] sm:$0xff] }
 0x112   :  { %1185 = vmatmul.bf16.gmra.mxu3 %v1092_v48  ;;  %v939_v37 = vpack.c.bf16 %v2016_v1, %v2015_v30 }
 0x114   :  { %v411_v6 = vpop.f32.mrf.mxu2 }
 0x115   :  { %v566_v53 = vpop.f32.mrf.mxu3  ;;  %v442_v4 = vadd.f32 %v411_v6, %v2935_v47  ;;  %v2078_v47 = vld [vmem:[%s3313_s1 + $0x68] sm:$0xff] }
 0x116   :  { %v723_v19 = vpop.f32.mrf.mxu0  ;;  %v1093_v16 = vpack.c.bf16 %v2078_v47, %v2077_v22  ;;  %v2082_v6 = vld [vmem:[%s3313_s1 + $0x88] sm:$0xff] }
 0x117   :  { %v597_v57 = vadd.f32 %v566_v53, %v442_v4 }
 0x119   :  { %v2993_v42 = vadd.f32 %v721_v52, %v597_v57 }
 0x11c   :  { %v413_v60 = vpop.f32.mrf.mxu2 }
 0x11d   :  { %v568_v21 = vpop.f32.mrf.mxu3  ;;  %v443_v44 = vadd.f32 %v413_v60, %v276_v59 }
 0x11e   :  { %v726_v15 = vpop.f32.mrf.mxu0 }
 0x11f   :  { %v598_v2 = vadd.f32 %v568_v21, %v443_v44 }
 0x121   :  { %1035 = vmatmul.bf16.gmra.mxu2 %v938_v61  ;;  %v3009_v3 = vadd.f32 %v723_v19, %v598_v2  ;;  %1345 = vmatmul.bf16.gmra.mxu0 %v2861_v0  ;;  %v2079_v0 = vld [vmem:[%s3313_s1 + $0x70] sm:$0xff] }
 0x122   :  { %1190 = vmatmul.bf16.gmra.mxu3 %v1093_v16 }
 0x124   :  { %v416_v7 = vpop.f32.mrf.mxu2 }
 0x125   :  { %v571_v28 = vpop.f32.mrf.mxu3  ;;  %v444_v43 = vadd.f32 %v416_v7, %v2844_v40  ;;  %v2080_v40 = vld [vmem:[%s3313_s1 + $0x78] sm:$0xff] }
 0x126   :  { %v728_v14 = vpop.f32.mrf.mxu0  ;;  %v1094_v38 = vpack.c.bf16 %v2080_v40, %v2079_v0 }
 0x127   :  { %v599_v13 = vadd.f32 %v571_v28, %v444_v43 }
 0x129   :  { %v3013_v12 = vadd.f32 %v726_v15, %v599_v13 }
 0x12c   :  { %v418_v8 = vpop.f32.mrf.mxu2 }
 0x12d   :  { %v573_v10 = vpop.f32.mrf.mxu3  ;;  %v445_v25 = vadd.f32 %v418_v8, %v2859_v63  ;;  %v2081_v63 = vld [vmem:[%s3313_s1 + $0x80] sm:$0xff] }
 0x12e   :  { %v731_v26 = vpop.f32.mrf.mxu0  ;;  %v1095_v57 = vpack.c.bf16 %v2082_v6, %v2081_v63  ;;  %v873_v6 = vpop.f32.mrf.mxu1 }
 0x12f   :  { %v600_v50 = vadd.f32 %v573_v10, %v445_v25 }
 0x131   :  { %1040 = vmatmul.bf16.gmra.mxu2 %v939_v37  ;;  %v3028_v31 = vadd.f32 %v728_v14, %v600_v50  ;;  %1350 = vmatmul.bf16.gmra.mxu0 %v2893_v35 }
 0x132   :  { %1195 = vmatmul.bf16.gmra.mxu3 %v1094_v38 }
 0x134   :  { %v421_v32 = vpop.f32.mrf.mxu2 }
 0x135   :  { %v576_v34 = vpop.f32.mrf.mxu3  ;;  %v446_v48 = vadd.f32 %v421_v32, %v2876_v5 }
 0x136   :  { %v733_v54 = vpop.f32.mrf.mxu0 }
 0x137   :  { %v601_v51 = vadd.f32 %v576_v34, %v446_v48 }
 0x139   :  { %v3032_v52 = vadd.f32 %v731_v26, %v601_v51 }
 0x13c   :  { %v423_v53 = vpop.f32.mrf.mxu2 }
 0x13d   :  { %v578_v4 = vpop.f32.mrf.mxu3  ;;  %v447_v35 = vadd.f32 %v423_v53, %v2891_v33  ;;  %v2020_v33 = vld [vmem:[%s3314_s0 + $0x98] sm:$0xff] }
 0x13e   :  { %v736_v18 = vpop.f32.mrf.mxu0  ;;  %v941_v16 = vpack.c.bf16 %v2020_v33, %v2914_v27 }
 0x13f   :  { %v602_v19 = vadd.f32 %v578_v4, %v447_v35 }
 0x141   :  { %1045 = vmatmul.bf16.gmra.mxu2 %v2704_v36  ;;  %v3042_v5 = vadd.f32 %v733_v54, %v602_v19  ;;  %1355 = vmatmul.bf16.gmra.mxu0 %v2928_v23  ;;  %v2084_v36 = vld [vmem:[%s3313_s1 + $0x98] sm:$0xff] }
 0x142   :  { %1200 = vmatmul.bf16.gmra.mxu3 %v1095_v57  ;;  %v2148_v23 = vld [vmem:[%s3315_s2 + $0x98] sm:$0xff]  ;;  %v1096_v2 = vpack.c.bf16 %v2084_v36, %v2919_v29 }
 0x143   :  { %v1251_v15 = vpack.c.bf16 %v2148_v23, %v2924_v58 }
 0x144   :  { %v426_v20 = vpop.f32.mrf.mxu2 }
 0x145   :  { %v581_v22 = vpop.f32.mrf.mxu3  ;;  %v448_v47 = vadd.f32 %v426_v20, %v2902_v55 }
 0x146   :  { %v738_v60 = vpop.f32.mrf.mxu0 }
 0x147   :  { %v603_v59 = vadd.f32 %v581_v22, %v448_v47  ;;  %v876_v47 = vpop.f32.mrf.mxu1 }
 0x149   :  { %v3046_v21 = vadd.f32 %v736_v18, %v603_v59 }
 0x14c   :  { %v428_v44 = vpop.f32.mrf.mxu2 }
 0x14d   :  { %v583_v61 = vpop.f32.mrf.mxu3  ;;  %v449_v55 = vadd.f32 %v428_v44, %v2926_v17 }
 0x14e   :  { %v741_v28 = vpop.f32.mrf.mxu0 }
 0x14f   :  { %v604_v7 = vadd.f32 %v583_v61, %v449_v55  ;;  %v878_v55 = vpop.f32.mrf.mxu1 }
 0x151   :  { %1050 = vmatmul.bf16.gmra.mxu2 %v941_v16  ;;  %v3061_v43 = vadd.f32 %v738_v60, %v604_v7  ;;  %1360 = vmatmul.bf16.gmra.mxu0 %v1251_v15 }
 0x152   :  { %1205 = vmatmul.bf16.gmra.mxu3 %v1096_v2 }
 0x154   :  { %v431_v13 = vpop.f32.mrf.mxu2 }
 0x155   :  { %v586_v14 = vpop.f32.mrf.mxu3  ;;  %v450_v30 = vadd.f32 %v431_v13, %v2938_v9  ;;  %v902_v9 = vadd.f32 %v2950_v39, %v2958_v46  ;;  %v904_v39 = vadd.f32 %v2966_v45, %v2970_v11  ;;  %v906_v11 = vadd.f32 %v873_v6, %v2990_v56  ;;  %v2308_v6 = vld [vmem:[%s3316_s4 + $0x38] sm:$0xff] }
 0x156   :  { %v743_v0 = vpop.f32.mrf.mxu0  ;;  %1616 = vmatpush.bf16.msra.mxu1 %v2308_v6 }
 0x157   :  { %v605_v1 = vadd.f32 %v586_v14, %v450_v30 }
 0x159   :  { %v3064_v17 = vadd.f32 %v741_v28, %v605_v1  ;;  %v881_v1 = vpop.f32.mrf.mxu1 }
 0x15c   :  { %v433_v27 = vpop.f32.mrf.mxu2 }
 0x15d   :  { %v588_v40 = vpop.f32.mrf.mxu3  ;;  %v451_v29 = vadd.f32 %v433_v27, %v2944_v41  ;;  %v907_v27 = vadd.f32 %v876_v47, %v2993_v42 }
 0x15e   :  { %v1326_v8 = vpop.f32.mrf.mxu0 }
 0x15f   :  { %v606_v58 = vadd.f32 %v588_v40, %v451_v29 }
 0x161   :  { %v3067_v10 = vadd.f32 %v743_v0, %v606_v58 }
 0x164   :  { %v1016_v25 = vpop.f32.mrf.mxu2 }
 0x165   :  { %v1171_v37 = vpop.f32.mrf.mxu3  ;;  %v1056_v38 = vadd.f32 %v1016_v25, %v2954_v49 }
 0x166   :  { %v1328_v26 = vpop.f32.mrf.mxu0 }
 0x167   :  { %v1211_v50 = vadd.f32 %v1171_v37, %v1056_v38  ;;  %v908_v37 = vadd.f32 %v878_v55, %v3009_v3  ;;  %v883_v38 = vpop.f32.mrf.mxu1 }
 0x169   :  { %v3070_v32 = vadd.f32 %v1326_v8, %v1211_v50 }
 0x16c   :  { %v1018_v34 = vpop.f32.mrf.mxu2 }
 0x16d   :  { %v1173_v48 = vpop.f32.mrf.mxu3  ;;  %v1057_v51 = vadd.f32 %v1018_v34, %v902_v9 }
 0x16e   :  { %v1331_v41 = vpop.f32.mrf.mxu0 }
 0x16f   :  { %v1212_v54 = vadd.f32 %v1173_v48, %v1057_v51 }
 0x171   :  { %v3074_v63 = vadd.f32 %v1328_v26, %v1212_v54  ;;  %v909_v54 = vadd.f32 %v881_v1, %v3013_v12 }
 0x173   :  { %v1382_v53 = vadd.f32 %v3074_v63, %v3070_v32 }
 0x174   :  { %v1021_v4 = vpop.f32.mrf.mxu2 }
 0x175   :  { %v1176_v49 = vpop.f32.mrf.mxu3  ;;  %v1058_v35 = vadd.f32 %v1021_v4, %v2964_v62  ;;  %v886_v4 = vpop.f32.mrf.mxu1 }
 0x176   :  { %v1333_v19 = vpop.f32.mrf.mxu0 }
 0x177   :  { %v1213_v57 = vadd.f32 %v1176_v49, %v1058_v35 }
 0x179   :  { %v3079_v18 = vadd.f32 %v1331_v41, %v1213_v57 }
 0x17b   :  { %v1383_v46 = vadd.f32 %v1382_v53, %v3079_v18 }
 0x17c   :  { %v1023_v20 = vpop.f32.mrf.mxu2 }
 0x17d   :  { %v1178_v22 = vpop.f32.mrf.mxu3  ;;  %v1059_v59 = vadd.f32 %v1023_v20, %v904_v39  ;;  %v910_v39 = vadd.f32 %v883_v38, %v3028_v31  ;;  %v888_v47 = vpop.f32.mrf.mxu1 }
 0x17e   :  { %v1336_v33 = vpop.f32.mrf.mxu0 }
 0x17f   :  { %v1214_v60 = vadd.f32 %v1178_v22, %v1059_v59 }
 0x181   :  { %v3084_v36 = vadd.f32 %v1333_v19, %v1214_v60 }
 0x183   :  { %v1384_v23 = vadd.f32 %v1383_v46, %v3084_v36 }
 0x184   :  { %v1026_v62 = vpop.f32.mrf.mxu2 }
 0x185   :  { %v1181_v44 = vpop.f32.mrf.mxu3  ;;  %v1060_v61 = vadd.f32 %v1026_v62, %v2982_v24 }
 0x186   :  { %v1338_v2 = vpop.f32.mrf.mxu0 }
 0x187   :  { %v1215_v16 = vadd.f32 %v1181_v44, %v1060_v61  ;;  %v2307_v44 = vld [vmem:[%s3316_s4 + $0x30] sm:$0xff] }
 0x188   :  { %1617 = vmatpush.bf16.msra.mxu1 %v2307_v44 }
 0x189   :  { %v3088_v45 = vadd.f32 %v1336_v33, %v1215_v16 }
 0x18b   :  { %v1385_v15 = vadd.f32 %v1384_v23, %v3088_v45  ;;  %v911_v23 = vadd.f32 %v886_v4, %v3032_v52 }
 0x18c   :  { %v1028_v7 = vpop.f32.mrf.mxu2 }
 0x18d   :  { %v1183_v28 = vpop.f32.mrf.mxu3  ;;  %v1061_v13 = vadd.f32 %v1028_v7, %v906_v11  ;;  %v891_v11 = vpop.f32.mrf.mxu1  ;;  %v912_v7 = vadd.f32 %v888_v47, %v3042_v5 }
 0x18e   :  { %v1341_v30 = vpop.f32.mrf.mxu0 }
 0x18f   :  { %v1216_v14 = vadd.f32 %v1183_v28, %v1061_v13 }
 0x191   :  { %v3092_v0 = vadd.f32 %v1338_v2, %v1216_v14 }
 0x193   :  { %v1386_v24 = vadd.f32 %v1385_v15, %v3092_v0 }
 0x194   :  { %v1031_v40 = vpop.f32.mrf.mxu2 }
 0x195   :  { %v1186_v29 = vpop.f32.mrf.mxu3  ;;  %v1062_v58 = vadd.f32 %v1031_v40, %v907_v27  ;;  %v893_v40 = vpop.f32.mrf.mxu1 }
 0x196   :  { %v1343_v25 = vpop.f32.mrf.mxu0  ;;  %v914_v5 = vadd.f32 %v893_v40, %v3061_v43 }
 0x197   :  { %v1217_v8 = vadd.f32 %v1186_v29, %v1062_v58 }
 0x199   :  { %v3096_v56 = vadd.f32 %v1341_v30, %v1217_v8 }
 0x19b   :  { %v1387_v50 = vadd.f32 %v1386_v24, %v3096_v56  ;;  %v913_v24 = vadd.f32 %v891_v11, %v3046_v21 }
 0x19c   :  { %v1033_v26 = vpop.f32.mrf.mxu2 }
 0x19d   :  { %v1188_v9 = vpop.f32.mrf.mxu3  ;;  %v1063_v34 = vadd.f32 %v1033_v26, %v908_v37 }
 0x19e   :  { %v1346_v51 = vpop.f32.mrf.mxu0 }
 0x19f   :  { %v1218_v48 = vadd.f32 %v1188_v9, %v1063_v34 }
 0x1a1   :  { %v3100_v42 = vadd.f32 %v1343_v25, %v1218_v48 }
 0x1a3   :  { %v1388_v41 = vadd.f32 %v1387_v50, %v3100_v42 }
 0x1a4   :  { %v1036_v53 = vpop.f32.mrf.mxu2 }
 0x1a5   :  { %v1191_v3 = vpop.f32.mrf.mxu3  ;;  %v1064_v49 = vadd.f32 %v1036_v53, %v909_v54 }
 0x1a6   :  { %v1348_v57 = vpop.f32.mrf.mxu0 }
 0x1a7   :  { %v1219_v35 = vadd.f32 %v1191_v3, %v1064_v49  ;;  %v2331_v49 = vmov 128.0  }
 0x1a8   :  { %2327 = vrcp.f32 %v2331_v49 }
 0x1a9   :  { %v3107_v19 = vadd.f32 %v1346_v51, %v1219_v35  ;;  %v896_v51 = vpop.f32.mrf.mxu1 }
 0x1aa   :  { %v915_v21 = vadd.f32 %v896_v51, %v3064_v17 }
 0x1ab   :  { %v1389_v46 = vadd.f32 %v1388_v41, %v3107_v19 }
 0x1ac   :  { %v1038_v12 = vpop.f32.mrf.mxu2 }
 0x1ad   :  { %v1193_v20 = vpop.f32.mrf.mxu3  ;;  %v1065_v22 = vadd.f32 %v1038_v12, %v910_v39 }
 0x1ae   :  { %v1351_v60 = vpop.f32.mrf.mxu0 }
 0x1af   :  { %v1220_v59 = vadd.f32 %v1193_v20, %v1065_v22 }
 0x1b1   :  { %v3111_v33 = vadd.f32 %v1348_v57, %v1220_v59  ;;  %v898_v39 = vpop.f32.mrf.mxu1 }
 0x1b2   :  { %v916_v12 = vadd.f32 %v898_v39, %v3067_v10 }
 0x1b3   :  { %v1390_v62 = vadd.f32 %v1389_v46, %v3111_v33  ;;  %v2328_v46 = vpop.eup %2327 }
 0x1b4   :  { %v1041_v61 = vpop.f32.mrf.mxu2  ;;  %vm1408_vm0 = vweird.f32 %v2328_v46 }
 0x1b5   :  { %v1196_v31 = vpop.f32.mrf.mxu3  ;;  %v1066_v55 = vadd.f32 %v1041_v61, %v911_v23 }
 0x1b6   :  { %v1353_v2 = vpop.f32.mrf.mxu0 }
 0x1b7   :  { %v1221_v16 = vadd.f32 %v1196_v31, %v1066_v55 }
 0x1b9   :  { %v3118_v15 = vadd.f32 %v1351_v60, %v1221_v16  ;;  %v1404_v60 = vmul.f32 128.0, %v2328_v46 }
 0x1bb   :  { %v1391_v28 = vadd.f32 %v1390_v62, %v3118_v15  ;;  %v1405_v44 = vsub.f32 1.0, %v1404_v60 }
 0x1bc   :  { %v1043_v52 = vpop.f32.mrf.mxu2 }
 0x1bd   :  { %v1198_v13 = vpop.f32.mrf.mxu3  ;;  %v1067_v14 = vadd.f32 %v1043_v52, %v912_v7  ;;  %v1406_v55 = vmul.f32 %v2328_v46, %v1405_v44  ;;  %v2302_v44 = vld [vmem:[%s3316_s4 + $0x8] sm:$0xff] }
 0x1be   :  { %v1356_v27 = vpop.f32.mrf.mxu0 }
 0x1bf   :  { %v1222_v30 = vadd.f32 %v1198_v13, %v1067_v14  ;;  %v1407_v11 = vadd.f32 %v2328_v46, %v1406_v55 }
 0x1c1   :  { %v3122_v1 = vadd.f32 %v1353_v2, %v1222_v30  ;;  %v3129_v52 = vsel %vm1408_vm0, %v2328_v46, %v1407_v11 }
 0x1c3   :  { %v1392_v29 = vadd.f32 %v1391_v28, %v3122_v1 }
 0x1c4   :  { %v1046_v58 = vpop.f32.mrf.mxu2 }
 0x1c5   :  { %v1201_v8 = vpop.f32.mrf.mxu3  ;;  %v1068_v25 = vadd.f32 %v1046_v58, %v913_v24 }
 0x1c6   :  { %v1358_v26 = vpop.f32.mrf.mxu0 }
 0x1c7   :  { %v1223_v37 = vadd.f32 %v1201_v8, %v1068_v25 }
 0x1c9   :  { %v1378_v38 = vadd.f32 %v1356_v27, %v1223_v37 }
 0x1cb   :  { %v1393_v50 = vadd.f32 %v1392_v29, %v1378_v38 }
 0x1cc   :  { %v1048_v9 = vpop.f32.mrf.mxu2 }
 0x1cd   :  { %v1203_v34 = vpop.f32.mrf.mxu3  ;;  %v1069_v48 = vadd.f32 %v1048_v9, %v914_v5 }
 0x1ce   :  { %v1361_v35 = vpop.f32.mrf.mxu0 }
 0x1cf   :  { %v1224_v54 = vadd.f32 %v1203_v34, %v1069_v48 }
 0x1d1   :  { %v1379_v41 = vadd.f32 %v1358_v26, %v1224_v54 }
 0x1d3   :  { %v1394_v6 = vadd.f32 %v1393_v50, %v1379_v41 }
 0x1d4   :  { %v1051_v53 = vpop.f32.mrf.mxu2 }
 0x1d5   :  { %v1206_v3 = vpop.f32.mrf.mxu3  ;;  %v1070_v4 = vadd.f32 %v1051_v53, %v915_v21  ;;  %v2306_v53 = vld [vmem:[%s3316_s4 + $0x28] sm:$0xff] }
 0x1d6   :  { %v1363_v17 = vpop.f32.mrf.mxu0  ;;  %1618 = vmatpush.bf16.msra.mxu1 %v2306_v53 }
 0x1d7   :  { %v1225_v57 = vadd.f32 %v1206_v3, %v1070_v4 }
 0x1d9   :  { %v1380_v43 = vadd.f32 %v1361_v35, %v1225_v57  ;;  %v2305_v57 = vld [vmem:[%s3316_s4 + $0x20] sm:$0xff] }
 0x1da   :  { %1619 = vmatpush.bf16.msra.mxu1 %v2305_v57 }
 0x1db   :  { %v1395_v20 = vadd.f32 %v1394_v6, %v1380_v43 }
 0x1dc   :  { %v1053_v22 = vpop.f32.mrf.mxu2 }
 0x1dd   :  { %v1071_v47 = vadd.f32 %v1053_v22, %v916_v12  ;;  %v1208_v59 = vpop.f32.mrf.mxu3 }
 0x1df   :  { %v1226_v23 = vadd.f32 %v1208_v59, %v1071_v47 }
 0x1e1   :  { %v1381_v62 = vadd.f32 %v1363_v17, %v1226_v23  ;;  %v2303_v23 = vld [vmem:[%s3316_s4 + $0x10] sm:$0xff] }
 0x1e3   :  { %v1396_v61 = vadd.f32 %v1395_v20, %v1381_v62  ;;  %v2304_v20 = vld [vmem:[%s3316_s4 + $0x18] sm:$0xff] }
 0x1e4   :  { %1620 = vmatpush.bf16.msra.mxu1 %v2304_v20 }
 0x1e5   :  { %v1397_v31 = vrot.slane %v1396_v61, 4 }
 0x1e7   :  { %v1398_v16 = vadd.f32 %v1397_v31, %v1396_v61  ;;  %v2301_v31 = vld [vmem:[%s3316_s4] sm:$0xff] }
 0x1e8   :  { %1621 = vmatpush.bf16.msra.mxu1 %v2303_v23 }
 0x1e9   :  { %v1399_v2 = vrot.slane %v1398_v16, 2 }
 0x1eb   :  { %v1400_v7 = vadd.f32 %v1399_v2, %v1398_v16 }
 0x1ec   :  { %1622 = vmatpush.bf16.msra.mxu1 %v2302_v44 }
 0x1ed   :  { %v1401_v28 = vrot.slane %v1400_v7, 1 }
 0x1ef   :  { %v1402_v10 = vadd.f32 %v1401_v28, %v1400_v7 }
 0x1f0   :  { %1623 = vmatpush.bf16.msra.mxu1 %v2301_v31 }
 0x1f1   :  { %v1410_v13 = vmul.f32 %v3129_v52, %v1402_v10 }
 0x1f3   :  { %v3133_v14 = vsub.f32 %v3070_v32, %v1410_v13  ;;  %v3136_v30 = vsub.f32 %v3074_v63, %v1410_v13  ;;  %v3139_v27 = vsub.f32 %v3079_v18, %v1410_v13  ;;  %v3142_v24 = vsub.f32 %v3084_v36, %v1410_v13 }
 0x1f4   :  { %v3145_v40 = vsub.f32 %v3088_v45, %v1410_v13  ;;  %v3148_v29 = vsub.f32 %v3092_v0, %v1410_v13  ;;  %v3151_v58 = vsub.f32 %v3096_v56, %v1410_v13  ;;  %v3154_v32 = vsub.f32 %v3100_v42, %v1410_v13 }
 0x1f5   :  { %v3157_v63 = vsub.f32 %v3107_v19, %v1410_v13  ;;  %v3160_v18 = vsub.f32 %v3111_v33, %v1410_v13  ;;  %v3163_v36 = vsub.f32 %v3118_v15, %v1410_v13  ;;  %v3166_v45 = vsub.f32 %v3122_v1, %v1410_v13 }
 0x1f6   :  { %v3168_v0 = vsub.f32 %v1378_v38, %v1410_v13  ;;  %v3170_v8 = vsub.f32 %v1379_v41, %v1410_v13  ;;  %v3172_v56 = vsub.f32 %v1380_v43, %v1410_v13  ;;  %v3174_v42 = vsub.f32 %v1381_v62, %v1410_v13 }
 0x1f7   :  { %v1427_v19 = vmul.f32 %v3133_v14, %v3133_v14  ;;  %v1428_v33 = vmul.f32 %v3136_v30, %v3136_v30  ;;  %v1429_v15 = vmul.f32 %v3139_v27, %v3139_v27  ;;  %v1430_v1 = vmul.f32 %v3142_v24, %v3142_v24 }
 0x1f8   :  { %v1431_v38 = vmul.f32 %v3145_v40, %v3145_v40  ;;  %v1432_v50 = vmul.f32 %v3148_v29, %v3148_v29  ;;  %v1433_v9 = vmul.f32 %v3151_v58, %v3151_v58  ;;  %v1434_v48 = vmul.f32 %v3154_v32, %v3154_v32 }
 0x1f9   :  { %v1443_v25 = vadd.f32 %v1428_v33, %v1427_v19  ;;  %v1435_v54 = vmul.f32 %v3157_v63, %v3157_v63  ;;  %v1436_v21 = vmul.f32 %v3160_v18, %v3160_v18  ;;  %v1437_v3 = vmul.f32 %v3163_v36, %v3163_v36 }
 0x1fa   :  { %v1438_v49 = vmul.f32 %v3166_v45, %v3166_v45  ;;  %v1439_v39 = vmul.f32 %v3168_v0, %v3168_v0  ;;  %v1440_v46 = vmul.f32 %v3170_v8, %v3170_v8  ;;  %v1441_v22 = vmul.f32 %v3172_v56, %v3172_v56 }
 0x1fb   :  { %v1444_v37 = vadd.f32 %v1443_v25, %v1429_v15  ;;  %v1442_v59 = vmul.f32 %v3174_v42, %v3174_v42 }
 0x1fd   :  { %v1445_v5 = vadd.f32 %v1444_v37, %v1430_v1 }
 0x1ff   :  { %v1446_v26 = vadd.f32 %v1445_v5, %v1431_v38 }
 0x201   :  { %v1447_v34 = vadd.f32 %v1446_v26, %v1432_v50 }
 0x203   :  { %v1448_v51 = vadd.f32 %v1447_v34, %v1433_v9 }
 0x205   :  { %v1449_v41 = vadd.f32 %v1448_v51, %v1434_v48 }
 0x207   :  { %v1450_v6 = vadd.f32 %v1449_v41, %v1435_v54 }
 0x209   :  { %v1451_v4 = vadd.f32 %v1450_v6, %v1436_v21 }
 0x20b   :  { %v1452_v35 = vadd.f32 %v1451_v4, %v1437_v3 }
 0x20d   :  { %v1453_v43 = vadd.f32 %v1452_v35, %v1438_v49 }
 0x20f   :  { %v1454_v12 = vadd.f32 %v1453_v43, %v1439_v39 }
 0x211   :  { %v1455_v47 = vadd.f32 %v1454_v12, %v1440_v46 }
 0x213   :  { %v1456_v60 = vadd.f32 %v1455_v47, %v1441_v22 }
 0x215   :  { %v1457_v17 = vadd.f32 %v1456_v60, %v1442_v59 }
 0x217   :  { %v1458_v62 = vrot.slane %v1457_v17, 4 }
 0x219   :  { %v1459_v61 = vadd.f32 %v1458_v62, %v1457_v17 }
 0x21b   :  { %v1460_v55 = vrot.slane %v1459_v61, 2 }
 0x21d   :  { %v1461_v16 = vadd.f32 %v1460_v55, %v1459_v61 }
 0x21f   :  { %v1462_v2 = vrot.slane %v1461_v16, 1 }
 0x221   :  { %v1463_v11 = vadd.f32 %v1462_v2, %v1461_v16 }
 0x223   :  { %v1464_v7 = vmul.f32 %v1463_v11, %v3129_v52 }
 0x225   :  { %v1465_v28 = vadd.f32 1e-05, %v1464_v7 }
 0x227   :  { %2329 = vrsqrt.f32 %v1465_v28  ;;  %vm1472_vm2 = vweird.f32 %v1465_v28 }
 0x22d   :  { %v2330_v10 = vpop.eup %2329 }
 0x22e   :  { %v1467_v13 = vmul.f32 %v2330_v10, %v1465_v28  ;;  %vm1473_vm1 = vweird.f32 %v2330_v10 }
 0x22f   :  { %vm1474_vm3 = vmor %vm1472_vm2, %vm1473_vm1 }
 0x230   :  { %v1468_v19 = vmul.f32 %v2330_v10, %v1467_v13  ;;  %v2326_v13 = vld [vmem:[%s3317_s5] ss:$0 sm:$0xff] }
 0x232   :  { %v1469_v33 = vmul.f32 0.5, %v1468_v19 }
 0x234   :  { %v1470_v15 = vsub.f32 1.5, %v1469_v33 }
 0x236   :  { %v1471_v25 = vmul.f32 %v2330_v10, %v1470_v15 }
 0x238   :  { %v3227_v1 = vsel %vm1474_vm3, %v2330_v10, %v1471_v25 }
 0x239   :  { %v1476_v37 = vmul.f32 %v3227_v1, %v3133_v14  ;;  %v1477_v38 = vmul.f32 %v3227_v1, %v3136_v30  ;;  %v1478_v34 = vmul.f32 %v3227_v1, %v3139_v27  ;;  %v1479_v48 = vmul.f32 %v3227_v1, %v3142_v24 }
 0x23a   :  { %v1480_v21 = vmul.f32 %v3227_v1, %v3145_v40  ;;  %v1481_v6 = vmul.f32 %v3227_v1, %v3148_v29  ;;  %v1482_v49 = vmul.f32 %v3227_v1, %v3151_v58  ;;  %v1483_v35 = vmul.f32 %v3227_v1, %v3154_v32 }
 0x23b   :  { %vm1492_vm4 = vcmp.ge.f32.partialorder %v1476_v37, 0.0  ;;  %vm1493_vm5 = vcmp.ge.f32.partialorder %v1477_v38, 0.0  ;;  %v1508_v52 = vmul.f32 0.1, %v1476_v37  ;;  %v1509_v5 = vmul.f32 0.1, %v1477_v38 }
 0x23c   :  { %v1510_v51 = vmul.f32 0.1, %v1478_v34  ;;  %v1511_v54 = vmul.f32 0.1, %v1479_v48  ;;  %vm1494_vm6 = vcmp.ge.f32.partialorder %v1478_v34, 0.0  ;;  %vm1495_vm7 = vcmp.ge.f32.partialorder %v1479_v48, 0.0 }
 0x23d   :  { %v1524_v50 = vsel %vm1492_vm4, %v1476_v37, %v1508_v52  ;;  %v1525_v26 = vsel %vm1493_vm5, %v1477_v38, %v1509_v5  ;;  %v1512_v53 = vmul.f32 0.1, %v1480_v21  ;;  %v1513_v3 = vmul.f32 0.1, %v1481_v6 }
 0x23e   :  { %v1540_v9 = vpack.c.bf16 %v1525_v26, %v1524_v50  ;;  %v1526_v14 = vsel %vm1494_vm6, %v1478_v34, %v1510_v51  ;;  %v1527_v30 = vsel %vm1495_vm7, %v1479_v48, %v1511_v54  ;;  %vm1496_vm8 = vcmp.ge.f32.partialorder %v1480_v21, 0.0 }
 0x23f   :  { %v1541_v41 = vpack.c.bf16 %v1527_v30, %v1526_v14  ;;  %vm1497_vm9 = vcmp.ge.f32.partialorder %v1481_v6, 0.0  ;;  %v1528_v27 = vsel %vm1496_vm8, %v1480_v21, %v1512_v53  ;;  %v1514_v57 = vmul.f32 0.1, %v1482_v49 }
 0x240   :  { %1624 = vmatmul.bf16.vlgmr.msra.gmra.mxu1 %v1540_v9  ;;  %v1529_v24 = vsel %vm1497_vm9, %v1481_v6, %v1513_v3  ;;  %v1515_v39 = vmul.f32 0.1, %v1483_v35  ;;  %vm1498_vm10 = vcmp.ge.f32.partialorder %v1482_v49, 0.0  ;;  %vm1499_vm11 = vcmp.ge.f32.partialorder %v1483_v35, 0.0 }
 0x241   :  { %v1542_v4 = vpack.c.bf16 %v1529_v24, %v1528_v27  ;;  %v1530_v40 = vsel %vm1498_vm10, %v1482_v49, %v1514_v57  ;;  %v1484_v46 = vmul.f32 %v3227_v1, %v3157_v63  ;;  %v1485_v12 = vmul.f32 %v3227_v1, %v3160_v18 }
 0x242   :  { %v1531_v29 = vsel %vm1499_vm11, %v1483_v35, %v1515_v39  ;;  %v1486_v59 = vmul.f32 %v3227_v1, %v3163_v36  ;;  %v1487_v60 = vmul.f32 %v3227_v1, %v3166_v45  ;;  %v1488_v44 = vmul.f32 %v3227_v1, %v3168_v0 }
 0x243   :  { %v1543_v43 = vpack.c.bf16 %v1531_v29, %v1530_v40  ;;  %v1516_v20 = vmul.f32 0.1, %v1484_v46  ;;  %v1517_v22 = vmul.f32 0.1, %v1485_v12  ;;  %vm1500_vm12 = vcmp.ge.f32.partialorder %v1484_v46, 0.0 }
 0x244   :  { %vm1501_vm13 = vcmp.ge.f32.partialorder %v1485_v12, 0.0  ;;  %v1518_v23 = vmul.f32 0.1, %v1486_v59  ;;  %v1519_v17 = vmul.f32 0.1, %v1487_v60  ;;  %vm1502_vm14 = vcmp.ge.f32.partialorder %v1486_v59, 0.0 }
 0x245   :  { %v1532_v58 = vsel %vm1500_vm12, %v1484_v46, %v1516_v20  ;;  %v1533_v32 = vsel %vm1501_vm13, %v1485_v12, %v1517_v22  ;;  %vm1503_vm15 = vcmp.ge.f32.partialorder %v1487_v60, 0.0  ;;  %v1489_v61 = vmul.f32 %v3227_v1, %v3170_v8 }
 0x246   :  { %v1544_v47 = vpack.c.bf16 %v1533_v32, %v1532_v58  ;;  %v1534_v63 = vsel %vm1502_vm14, %v1486_v59, %v1518_v23  ;;  %v1535_v18 = vsel %vm1503_vm15, %v1487_v60, %v1519_v17  ;;  %v1520_v31 = vmul.f32 0.1, %v1488_v44 }
 0x247   :  { %v1545_v62 = vpack.c.bf16 %v1535_v18, %v1534_v63  ;;  %v1521_v55 = vmul.f32 0.1, %v1489_v61  ;;  %vm1504_vm0 = vcmp.ge.f32.partialorder %v1488_v44, 0.0  ;;  %vm1505_vm1 = vcmp.ge.f32.partialorder %v1489_v61, 0.0 }
 0x248   :  { %v1536_v36 = vsel %vm1504_vm0, %v1488_v44, %v1520_v31  ;;  %v1491_v2 = vmul.f32 %v3227_v1, %v3174_v42  ;;  %v1490_v11 = vmul.f32 %v3227_v1, %v3172_v56 }
 0x249   :  { %v1537_v45 = vsel %vm1505_vm1, %v1489_v61, %v1521_v55 }
 0x24a   :  { %v1546_v16 = vpack.c.bf16 %v1537_v45, %v1536_v36  ;;  %v1522_v7 = vmul.f32 0.1, %v1490_v11  ;;  %v1523_v28 = vmul.f32 0.1, %v1491_v2  ;;  %vm1506_vm2 = vcmp.ge.f32.partialorder %v1490_v11, 0.0 }
 0x24b   :  { %vm1507_vm3 = vcmp.ge.f32.partialorder %v1491_v2, 0.0 }
 0x24c   :  { %v1538_v0 = vsel %vm1506_vm2, %v1490_v11, %v1522_v7  ;;  %v1539_v8 = vsel %vm1507_vm3, %v1491_v2, %v1523_v28 }
 0x24d   :  { %v1547_v10 = vpack.c.bf16 %v1539_v8, %v1538_v0 }
 0x250   :  { %1629 = vmatmul.bf16.gmra.mxu1 %v1541_v41 }
 0x260   :  { %1634 = vmatmul.bf16.gmra.mxu1 %v1542_v4 }
 0x270   :  { %1639 = vmatmul.bf16.gmra.mxu1 %v1543_v43 }
 0x280   :  { %1644 = vmatmul.bf16.gmra.mxu1 %v1544_v47 }
 0x290   :  { %1649 = vmatmul.bf16.gmra.mxu1 %v1545_v62 }
 0x2a0   :  { %1654 = vmatmul.bf16.gmra.mxu1 %v1546_v16 }
 0x2b0   :  { %1659 = vmatmul.bf16.gmra.mxu1 %v1547_v10 }
 0x2bd   :  { %v1625_v19 = vpop.f32.mrf.mxu1 }
 0x2be   :  { %v1626_v33 = vadd.f32 %v2326_v13, %v1625_v19 }
 0x2c0   :  { %1665 = vst [vmem:[%s3318_s6] sm:$0xff] %v1626_v33 }
 0x2c5   :  { %v1627_v42 = vpop.f32.mrf.mxu1 }
 0x2c6   :  { %v1628_v56 = vadd.f32 %v2326_v13, %v1627_v42 }
 0x2c8   :  { %1666 = vst [vmem:[%s3318_s6 + $0x8] sm:$0xff] %v1628_v56 }
 0x2cd   :  { %v1630_v15 = vpop.f32.mrf.mxu1 }
 0x2ce   :  { %v1631_v25 = vadd.f32 %v2326_v13, %v1630_v15 }
 0x2d0   :  { %1667 = vst [vmem:[%s3318_s6 + $0x10] sm:$0xff] %v1631_v25 }
 0x2d5   :  { %v1632_v1 = vpop.f32.mrf.mxu1 }
 0x2d6   :  { %v1633_v37 = vadd.f32 %v2326_v13, %v1632_v1 }
 0x2d8   :  { %1668 = vst [vmem:[%s3318_s6 + $0x18] sm:$0xff] %v1633_v37 }
 0x2dd   :  { %v1635_v38 = vpop.f32.mrf.mxu1 }
 0x2de   :  { %v1636_v52 = vadd.f32 %v2326_v13, %v1635_v38 }
 0x2e0   :  { %1669 = vst [vmem:[%s3318_s6 + $0x20] sm:$0xff] %v1636_v52 }
 0x2e5   :  { %v1637_v5 = vpop.f32.mrf.mxu1 }
 0x2e6   :  { %v1638_v50 = vadd.f32 %v2326_v13, %v1637_v5 }
 0x2e8   :  { %1670 = vst [vmem:[%s3318_s6 + $0x28] sm:$0xff] %v1638_v50 }
 0x2ed   :  { %v1640_v26 = vpop.f32.mrf.mxu1 }
 0x2ee   :  { %v1641_v9 = vadd.f32 %v2326_v13, %v1640_v26 }
 0x2f0   :  { %1671 = vst [vmem:[%s3318_s6 + $0x30] sm:$0xff] %v1641_v9 }
 0x2f5   :  { %v1642_v34 = vpop.f32.mrf.mxu1 }
 0x2f6   :  { %v1643_v48 = vadd.f32 %v2326_v13, %v1642_v34 }
 0x2f8   :  { %1672 = vst [vmem:[%s3318_s6 + $0x38] sm:$0xff] %v1643_v48 }
 0x2fd   :  { %v1645_v51 = vpop.f32.mrf.mxu1 }
 0x2fe   :  { %v1646_v54 = vadd.f32 %v2326_v13, %v1645_v51 }
 0x300   :  { %1673 = vst [vmem:[%s3318_s6 + $0x40] sm:$0xff] %v1646_v54 }
 0x305   :  { %v1647_v14 = vpop.f32.mrf.mxu1 }
 0x306   :  { %v1648_v30 = vadd.f32 %v2326_v13, %v1647_v14 }
 0x308   :  { %1674 = vst [vmem:[%s3318_s6 + $0x48] sm:$0xff] %v1648_v30 }
 0x30d   :  { %v1650_v41 = vpop.f32.mrf.mxu1 }
 0x30e   :  { %v1651_v21 = vadd.f32 %v2326_v13, %v1650_v41 }
 0x310   :  { %1675 = vst [vmem:[%s3318_s6 + $0x50] sm:$0xff] %v1651_v21 }
 0x315   :  { %v1652_v6 = vpop.f32.mrf.mxu1 }
 0x316   :  { %v1653_v53 = vadd.f32 %v2326_v13, %v1652_v6 }
 0x318   :  { %1676 = vst [vmem:[%s3318_s6 + $0x58] sm:$0xff] %v1653_v53 }
 0x31d   :  { %v1655_v3 = vpop.f32.mrf.mxu1 }
 0x31e   :  { %v1656_v27 = vadd.f32 %v2326_v13, %v1655_v3 }
 0x320   :  { %1677 = vst [vmem:[%s3318_s6 + $0x60] sm:$0xff] %v1656_v27 }
 0x325   :  { %v1657_v24 = vpop.f32.mrf.mxu1 }
 0x326   :  { %v1658_v4 = vadd.f32 %v2326_v13, %v1657_v24 }
 0x328   :  { %1678 = vst [vmem:[%s3318_s6 + $0x68] sm:$0xff] %v1658_v4 }
 0x32d   :  { %v1660_v49 = vpop.f32.mrf.mxu1 }
 0x32e   :  { %v1661_v35 = vadd.f32 %v2326_v13, %v1660_v49 }
 0x330   :  { %1679 = vst [vmem:[%s3318_s6 + $0x70] sm:$0xff] %v1661_v35 }
 0x335   :  { %v1662_v57 = vpop.f32.mrf.mxu1 }
 0x336   :  { %v1663_v39 = vadd.f32 %v2326_v13, %v1662_v57 }
 0x338   :  { %1680 = vst [vmem:[%s3318_s6 + $0x78] sm:$0xff] %v1663_v39 }

</bundles_post_ra>
